<compile_context>
chip_gen: v7x
topology: tpu7x:2x2x1
jax: 0.10.0
libtpu: 0.0.40
codegen_flags: <defaults>
</compile_context>

<pallas_src>
import numpy as np
import jax
import jax.numpy as jnp
from jax.experimental import pallas as pl
from jax.experimental.pallas import tpu as pltpu

LEAKY_SLOPE = 0.2
BN_EPS = 1e-5
KS = 4            # all convs are 4x4
TAPS = KS * KS    # 16 kernel taps
OUT_LANES = 128   # lane-dense final output width (real logit lives in column 0)


def _vmem_spec():
    return pl.BlockSpec(memory_space=pltpu.MemorySpace.VMEM)


# ----------------------------- fused Pallas kernel -----------------------------

def _make_disc_kernel(n_batch, num_units):
    """Builds the fused kernel for a fixed (static) batch size / unit count."""

    def kernel(*refs):
        p0_ref, w0_ref, b0_ref = refs[0:3]
        unit_refs = [refs[3 + 4 * u: 7 + 4 * u] for u in range(num_units)]
        wf_ref, bf_ref = refs[3 + 4 * num_units], refs[4 + 4 * num_units]
        o_ref = refs[-1]

        # ---- conv0 + bias + LeakyReLU; rows = (n, h, w), cols = channels ----
        act = jnp.dot(p0_ref[...], w0_ref[...], preferred_element_type=jnp.float32)
        act = act + b0_ref[...]
        act = jnp.maximum(act, LEAKY_SLOPE * act)

        # ---- units: conv(no bias) + BatchNorm(train-mode batch stats) + LeakyReLU
        # conv = sum over the 16 kernel taps of (gather-rows @ act) @ W[tap].
        # Gather matrices are 0/1; zero rows implement the spatial zero-padding.
        for u in range(num_units):
            g_ref, w_ref, gamma_ref, beta_ref = unit_refs[u]
            rows_out = g_ref.shape[1]
            c_out = w_ref.shape[2]
            acc = jnp.zeros((rows_out, c_out), jnp.float32)
            for t in range(TAPS):
                slab = jnp.dot(g_ref[t], act, preferred_element_type=jnp.float32)
                acc = acc + jnp.dot(slab, w_ref[t],
                                    preferred_element_type=jnp.float32)
            mean = jnp.mean(acc, axis=0, keepdims=True)
            var = jnp.mean(jnp.square(acc - mean), axis=0, keepdims=True)
            acc = (acc - mean) * jax.lax.rsqrt(var + BN_EPS)
            acc = acc * gamma_ref[...] + beta_ref[...]
            act = jnp.maximum(acc, LEAKY_SLOPE * acc)   # rows now = (h, w, n)

        # ---- final conv: 4x4 map -> 1x1 (window covers everything) + sigmoid.
        # act rows are (h, w, n) with n minor, so tap t uses a contiguous N-row slab.
        accf = jnp.zeros((n_batch, OUT_LANES), jnp.float32)
        for t in range(TAPS):
            accf = accf + jnp.dot(act[t * n_batch:(t + 1) * n_batch, :], wf_ref[t],
                                  preferred_element_type=jnp.float32)
        y = accf + bf_ref[...]
        o_ref[...] = 1.0 / (1.0 + jnp.exp(-y))          # lane-dense (N, 128) store

    return kernel


# ------------------------------ param preparation ------------------------------

def _gather_matrices(s_in, s_out, n_batch, in_rows_nhw):
    """0/1 matrices G[t] such that G[t] @ act_in yields, for every output
    position (ho, wo, n) (n minor), the input row feeding kernel tap
    t = kh*4 + kw of a 4x4 / stride-2 / pad-1 conv; out-of-range taps -> zero rows."""
    p_in, p_out = n_batch * s_in * s_in, n_batch * s_out * s_out
    g = np.zeros((TAPS, p_out, p_in), np.float32)
    for kh in range(KS):
        for kw in range(KS):
            t = kh * KS + kw
            for ho in range(s_out):
                for wo in range(s_out):
                    h = 2 * ho + kh - 1
                    w = 2 * wo + kw - 1
                    if 0 <= h < s_in and 0 <= w < s_in:
                        for n in range(n_batch):
                            r_out = (ho * s_out + wo) * n_batch + n
                            r_in = ((n * s_in + h) * s_in + w) if in_rows_nhw \
                                else ((h * s_in + w) * n_batch + n)
                            g[t, r_out, r_in] = 1.0
    return jnp.asarray(g)


def prep_discriminator(params, batch, img_dim):
    """Hoist all weight reshapes / gather-matrix construction out of the hot path."""
    num_units = len(params["units"])
    assert num_units >= 1, "fused kernel expects img_dim >= 16"
    # TODO(synk): img_dim == 8 (zero BN units) would need a different final-layer
    #             row ordering; not required for this config.

    w0 = params["w0"]
    c0, cin = w0.shape[0], w0.shape[1]
    w0mat = jnp.transpose(w0, (2, 3, 1, 0)).reshape(TAPS * cin, c0).astype(jnp.float32)
    b0row = params["b0"].reshape(1, c0).astype(jnp.float32)

    units = []
    s_in = img_dim // 2                       # spatial size entering unit 0
    for u, (w, g, b) in enumerate(params["units"]):
        c_out, c_in = w.shape[0], w.shape[1]
        gmat = _gather_matrices(s_in, s_in // 2, batch, in_rows_nhw=(u == 0))
        wblk = jnp.transpose(w, (2, 3, 1, 0)).reshape(TAPS, c_in, c_out).astype(jnp.float32)
        units.append((gmat, wblk,
                      g.reshape(1, c_out).astype(jnp.float32),
                      b.reshape(1, c_out).astype(jnp.float32)))
        s_in //= 2
    assert s_in == 4, "final conv expects a 4x4 feature map"

    wf = params["wf"]
    c_last = wf.shape[1]
    wfblk = jnp.transpose(wf, (2, 3, 1, 0)).reshape(TAPS, c_last, 1)
    wfblk = jnp.pad(wfblk, ((0, 0), (0, 0), (0, OUT_LANES - 1))).astype(jnp.float32)
    bfrow = jnp.pad(params["bf"].reshape(1, 1),
                    ((0, 0), (0, OUT_LANES - 1))).astype(jnp.float32)

    return {"w0": w0mat, "b0": b0row, "units": units, "wf": wfblk, "bf": bfrow}


# ---------------------------------- forward ------------------------------------

@jax.jit
def discriminator_forward(prepped, x_nchw):
    n, cin, hdim, _ = x_nchw.shape
    s0 = hdim // 2
    num_units = len(prepped["units"])

    # im2col for the first conv only (pad=1, stride=2, k=4); rows (n, h, w),
    # cols (kh, kw, cin). Runs once on the raw input and fuses under jit.
    x = jnp.transpose(x_nchw, (0, 2, 3, 1)).astype(jnp.float32)
    x = jnp.pad(x, ((0, 0), (1, 1), (1, 1), (0, 0)))
    taps = [x[:, kh:kh + 2 * s0 - 1:2, kw:kw + 2 * s0 - 1:2, :]
            for kh in range(KS) for kw in range(KS)]
    patches0 = jnp.stack(taps, axis=3).reshape(n * s0 * s0, TAPS * cin)

    unit_args = [a for unit in prepped["units"] for a in unit]
    num_inputs = 5 + 4 * num_units

    out = pl.pallas_call(
        _make_disc_kernel(n, num_units),
        out_shape=jax.ShapeDtypeStruct((n, OUT_LANES), jnp.float32),
        in_specs=[_vmem_spec()] * num_inputs,
        out_specs=_vmem_spec(),
    )(patches0, prepped["w0"], prepped["b0"], *unit_args,
      prepped["wf"], prepped["bf"])

    return out[:, :1].reshape(n, 1, 1, 1)   # NCHW (N, 1, 1, 1)


# ----------------------------------- params -------------------------------------

def make_params(img_channels, intermediate_channels, img_dim, key):
    needed_units = int(np.log2(img_dim)) - 3
    ic = intermediate_channels
    keys = jax.random.split(key, 4 + 3 * max(needed_units, 1))
    kidx = iter(range(len(keys)))

    params = {}
    params["w0"] = 0.05 * jax.random.normal(
        keys[next(kidx)], (ic, img_channels, 4, 4), jnp.float32)
    params["b0"] = 0.05 * jax.random.normal(keys[next(kidx)], (ic,), jnp.float32)

    units = []
    in_c = ic
    for i in range(needed_units):
        out_c = ic * (2 * 2 ** i)
        w = 0.05 * jax.random.normal(keys[next(kidx)], (out_c, in_c, 4, 4), jnp.float32)
        g = 1.0 + 0.05 * jax.random.normal(keys[next(kidx)], (out_c,), jnp.float32)
        b = 0.05 * jax.random.normal(keys[next(kidx)], (out_c,), jnp.float32)
        units.append((w, g, b))
        in_c = out_c
    params["units"] = units

    params["wf"] = 0.05 * jax.random.normal(keys[next(kidx)], (1, in_c, 4, 4), jnp.float32)
    params["bf"] = 0.05 * jax.random.normal(keys[next(kidx)], (1,), jnp.float32)
    return params


# ------------------------------------ main --------------------------------------

if __name__ == "__main__":
    img_channels, intermediate_channels, img_dim = 4, 8, 16
    batch = 2

    root = jax.random.PRNGKey(0)
    kx, kp = jax.random.split(root)
    x = jax.random.normal(kx, (batch, img_channels, img_dim, img_dim), jnp.float32)

    params = make_params(img_channels, intermediate_channels, img_dim, kp)
    prepped = prep_discriminator(params, batch, img_dim)

    out = discriminator_forward(prepped, x)
    out = jax.block_until_ready(out)

    assert out.shape == (batch, 1, 1, 1), out.shape
    assert bool(jnp.all(jnp.isfinite(out)))
    assert bool(jnp.all((out >= 0.0) & (out <= 1.0)))  # sigmoid range
    print("KERNEL_OK")
</pallas_src>

<mosaic_0001>
module attributes {stable_mosaic.version = 11 : i64} {
  func.func @kernel(%arg0: memref<128x64xf32, #tpu.memory_space<vmem>>, %arg1: memref<64x8xf32, #tpu.memory_space<vmem>>, %arg2: memref<1x8xf32, #tpu.memory_space<vmem>>, %arg3: memref<16x32x128xf32, #tpu.memory_space<vmem>>, %arg4: memref<16x8x16xf32, #tpu.memory_space<vmem>>, %arg5: memref<1x16xf32, #tpu.memory_space<vmem>>, %arg6: memref<1x16xf32, #tpu.memory_space<vmem>>, %arg7: memref<16x16x128xf32, #tpu.memory_space<vmem>>, %arg8: memref<1x128xf32, #tpu.memory_space<vmem>>, %arg9: memref<2x128xf32, #tpu.memory_space<vmem>>) attributes {dimension_semantics = [], scalar_prefetch = 0 : i64, scratch_operands = 0 : i64, tpu.core_type = #tpu.core_type<tc>} {
    %c0 = arith.constant 0 : index
    %c0_0 = arith.constant 0 : index
    %0 = vector.load %arg0[%c0, %c0_0] : memref<128x64xf32, #tpu.memory_space<vmem>>, vector<128x64xf32>
    %c0_1 = arith.constant 0 : index
    %c0_2 = arith.constant 0 : index
    %1 = vector.load %arg1[%c0_1, %c0_2] : memref<64x8xf32, #tpu.memory_space<vmem>>, vector<64x8xf32>
    %cst = arith.constant dense<0.000000e+00> : vector<128x8xf32>
    %2 = tpu.matmul %0, %1, %cst {dimension_numbers = #tpu.dot_dimension_numbers<[1], [0], [0], [1], [0, 0, 1, 1], [], []>} : vector<128x64xf32>, vector<64x8xf32>, vector<128x8xf32> -> vector<128x8xf32>
    %c0_3 = arith.constant 0 : index
    %c0_4 = arith.constant 0 : index
    %3 = vector.load %arg2[%c0_3, %c0_4] : memref<1x8xf32, #tpu.memory_space<vmem>>, vector<1x8xf32>
    %4 = vector.broadcast %3 : vector<1x8xf32> to vector<128x8xf32>
    %5 = arith.addf %2, %4 : vector<128x8xf32>
    %cst_5 = arith.constant 2.000000e-01 : f32
    %6 = vector.broadcast %cst_5 : f32 to vector<128x8xf32>
    %7 = arith.mulf %6, %5 : vector<128x8xf32>
    %8 = arith.maximumf %5, %7 : vector<128x8xf32>
    %cst_6 = arith.constant 0.000000e+00 : f32
    %9 = vector.broadcast %cst_6 : f32 to vector<32x16xf32>
    %c0_7 = arith.constant 0 : index
    %c0_8 = arith.constant 0 : index
    %c0_9 = arith.constant 0 : index
    %10 = vector.load %arg3[%c0_7, %c0_8, %c0_9] : memref<16x32x128xf32, #tpu.memory_space<vmem>>, vector<1x32x128xf32>
    %11 = vector.shape_cast %10 : vector<1x32x128xf32> to vector<32x128xf32>
    %cst_10 = arith.constant dense<0.000000e+00> : vector<32x8xf32>
    %12 = tpu.matmul %11, %8, %cst_10 {dimension_numbers = #tpu.dot_dimension_numbers<[1], [0], [0], [1], [0, 0, 1, 1], [], []>} : vector<32x128xf32>, vector<128x8xf32>, vector<32x8xf32> -> vector<32x8xf32>
    %c0_11 = arith.constant 0 : index
    %c0_12 = arith.constant 0 : index
    %c0_13 = arith.constant 0 : index
    %13 = vector.load %arg4[%c0_11, %c0_12, %c0_13] : memref<16x8x16xf32, #tpu.memory_space<vmem>>, vector<1x8x16xf32>
    %14 = vector.shape_cast %13 : vector<1x8x16xf32> to vector<8x16xf32>
    %cst_14 = arith.constant dense<0.000000e+00> : vector<32x16xf32>
    %15 = tpu.matmul %12, %14, %cst_14 {dimension_numbers = #tpu.dot_dimension_numbers<[1], [0], [0], [1], [0, 0, 1, 1], [], []>} : vector<32x8xf32>, vector<8x16xf32>, vector<32x16xf32> -> vector<32x16xf32>
    %16 = arith.addf %9, %15 : vector<32x16xf32>
    %c1 = arith.constant 1 : index
    %c0_15 = arith.constant 0 : index
    %c0_16 = arith.constant 0 : index
    %17 = vector.load %arg3[%c1, %c0_15, %c0_16] : memref<16x32x128xf32, #tpu.memory_space<vmem>>, vector<1x32x128xf32>
    %18 = vector.shape_cast %17 : vector<1x32x128xf32> to vector<32x128xf32>
    %cst_17 = arith.constant dense<0.000000e+00> : vector<32x8xf32>
    %19 = tpu.matmul %18, %8, %cst_17 {dimension_numbers = #tpu.dot_dimension_numbers<[1], [0], [0], [1], [0, 0, 1, 1], [], []>} : vector<32x128xf32>, vector<128x8xf32>, vector<32x8xf32> -> vector<32x8xf32>
    %c1_18 = arith.constant 1 : index
    %c0_19 = arith.constant 0 : index
    %c0_20 = arith.constant 0 : index
    %20 = vector.load %arg4[%c1_18, %c0_19, %c0_20] : memref<16x8x16xf32, #tpu.memory_space<vmem>>, vector<1x8x16xf32>
    %21 = vector.shape_cast %20 : vector<1x8x16xf32> to vector<8x16xf32>
    %cst_21 = arith.constant dense<0.000000e+00> : vector<32x16xf32>
    %22 = tpu.matmul %19, %21, %cst_21 {dimension_numbers = #tpu.dot_dimension_numbers<[1], [0], [0], [1], [0, 0, 1, 1], [], []>} : vector<32x8xf32>, vector<8x16xf32>, vector<32x16xf32> -> vector<32x16xf32>
    %23 = arith.addf %16, %22 : vector<32x16xf32>
    %c2 = arith.constant 2 : index
    %c0_22 = arith.constant 0 : index
    %c0_23 = arith.constant 0 : index
    %24 = vector.load %arg3[%c2, %c0_22, %c0_23] : memref<16x32x128xf32, #tpu.memory_space<vmem>>, vector<1x32x128xf32>
    %25 = vector.shape_cast %24 : vector<1x32x128xf32> to vector<32x128xf32>
    %cst_24 = arith.constant dense<0.000000e+00> : vector<32x8xf32>
    %26 = tpu.matmul %25, %8, %cst_24 {dimension_numbers = #tpu.dot_dimension_numbers<[1], [0], [0], [1], [0, 0, 1, 1], [], []>} : vector<32x128xf32>, vector<128x8xf32>, vector<32x8xf32> -> vector<32x8xf32>
    %c2_25 = arith.constant 2 : index
    %c0_26 = arith.constant 0 : index
    %c0_27 = arith.constant 0 : index
    %27 = vector.load %arg4[%c2_25, %c0_26, %c0_27] : memref<16x8x16xf32, #tpu.memory_space<vmem>>, vector<1x8x16xf32>
    %28 = vector.shape_cast %27 : vector<1x8x16xf32> to vector<8x16xf32>
    %cst_28 = arith.constant dense<0.000000e+00> : vector<32x16xf32>
    %29 = tpu.matmul %26, %28, %cst_28 {dimension_numbers = #tpu.dot_dimension_numbers<[1], [0], [0], [1], [0, 0, 1, 1], [], []>} : vector<32x8xf32>, vector<8x16xf32>, vector<32x16xf32> -> vector<32x16xf32>
    %30 = arith.addf %23, %29 : vector<32x16xf32>
    %c3 = arith.constant 3 : index
    %c0_29 = arith.constant 0 : index
    %c0_30 = arith.constant 0 : index
    %31 = vector.load %arg3[%c3, %c0_29, %c0_30] : memref<16x32x128xf32, #tpu.memory_space<vmem>>, vector<1x32x128xf32>
    %32 = vector.shape_cast %31 : vector<1x32x128xf32> to vector<32x128xf32>
    %cst_31 = arith.constant dense<0.000000e+00> : vector<32x8xf32>
    %33 = tpu.matmul %32, %8, %cst_31 {dimension_numbers = #tpu.dot_dimension_numbers<[1], [0], [0], [1], [0, 0, 1, 1], [], []>} : vector<32x128xf32>, vector<128x8xf32>, vector<32x8xf32> -> vector<32x8xf32>
    %c3_32 = arith.constant 3 : index
    %c0_33 = arith.constant 0 : index
    %c0_34 = arith.constant 0 : index
    %34 = vector.load %arg4[%c3_32, %c0_33, %c0_34] : memref<16x8x16xf32, #tpu.memory_space<vmem>>, vector<1x8x16xf32>
    %35 = vector.shape_cast %34 : vector<1x8x16xf32> to vector<8x16xf32>
    %cst_35 = arith.constant dense<0.000000e+00> : vector<32x16xf32>
    %36 = tpu.matmul %33, %35, %cst_35 {dimension_numbers = #tpu.dot_dimension_numbers<[1], [0], [0], [1], [0, 0, 1, 1], [], []>} : vector<32x8xf32>, vector<8x16xf32>, vector<32x16xf32> -> vector<32x16xf32>
    %37 = arith.addf %30, %36 : vector<32x16xf32>
    %c4 = arith.constant 4 : index
    %c0_36 = arith.constant 0 : index
    %c0_37 = arith.constant 0 : index
    %38 = vector.load %arg3[%c4, %c0_36, %c0_37] : memref<16x32x128xf32, #tpu.memory_space<vmem>>, vector<1x32x128xf32>
    %39 = vector.shape_cast %38 : vector<1x32x128xf32> to vector<32x128xf32>
    %cst_38 = arith.constant dense<0.000000e+00> : vector<32x8xf32>
    %40 = tpu.matmul %39, %8, %cst_38 {dimension_numbers = #tpu.dot_dimension_numbers<[1], [0], [0], [1], [0, 0, 1, 1], [], []>} : vector<32x128xf32>, vector<128x8xf32>, vector<32x8xf32> -> vector<32x8xf32>
    %c4_39 = arith.constant 4 : index
    %c0_40 = arith.constant 0 : index
    %c0_41 = arith.constant 0 : index
    %41 = vector.load %arg4[%c4_39, %c0_40, %c0_41] : memref<16x8x16xf32, #tpu.memory_space<vmem>>, vector<1x8x16xf32>
    %42 = vector.shape_cast %41 : vector<1x8x16xf32> to vector<8x16xf32>
    %cst_42 = arith.constant dense<0.000000e+00> : vector<32x16xf32>
    %43 = tpu.matmul %40, %42, %cst_42 {dimension_numbers = #tpu.dot_dimension_numbers<[1], [0], [0], [1], [0, 0, 1, 1], [], []>} : vector<32x8xf32>, vector<8x16xf32>, vector<32x16xf32> -> vector<32x16xf32>
    %44 = arith.addf %37, %43 : vector<32x16xf32>
    %c5 = arith.constant 5 : index
    %c0_43 = arith.constant 0 : index
    %c0_44 = arith.constant 0 : index
    %45 = vector.load %arg3[%c5, %c0_43, %c0_44] : memref<16x32x128xf32, #tpu.memory_space<vmem>>, vector<1x32x128xf32>
    %46 = vector.shape_cast %45 : vector<1x32x128xf32> to vector<32x128xf32>
    %cst_45 = arith.constant dense<0.000000e+00> : vector<32x8xf32>
    %47 = tpu.matmul %46, %8, %cst_45 {dimension_numbers = #tpu.dot_dimension_numbers<[1], [0], [0], [1], [0, 0, 1, 1], [], []>} : vector<32x128xf32>, vector<128x8xf32>, vector<32x8xf32> -> vector<32x8xf32>
    %c5_46 = arith.constant 5 : index
    %c0_47 = arith.constant 0 : index
    %c0_48 = arith.constant 0 : index
    %48 = vector.load %arg4[%c5_46, %c0_47, %c0_48] : memref<16x8x16xf32, #tpu.memory_space<vmem>>, vector<1x8x16xf32>
    %49 = vector.shape_cast %48 : vector<1x8x16xf32> to vector<8x16xf32>
    %cst_49 = arith.constant dense<0.000000e+00> : vector<32x16xf32>
    %50 = tpu.matmul %47, %49, %cst_49 {dimension_numbers = #tpu.dot_dimension_numbers<[1], [0], [0], [1], [0, 0, 1, 1], [], []>} : vector<32x8xf32>, vector<8x16xf32>, vector<32x16xf32> -> vector<32x16xf32>
    %51 = arith.addf %44, %50 : vector<32x16xf32>
    %c6 = arith.constant 6 : index
    %c0_50 = arith.constant 0 : index
    %c0_51 = arith.constant 0 : index
    %52 = vector.load %arg3[%c6, %c0_50, %c0_51] : memref<16x32x128xf32, #tpu.memory_space<vmem>>, vector<1x32x128xf32>
    %53 = vector.shape_cast %52 : vector<1x32x128xf32> to vector<32x128xf32>
    %cst_52 = arith.constant dense<0.000000e+00> : vector<32x8xf32>
    %54 = tpu.matmul %53, %8, %cst_52 {dimension_numbers = #tpu.dot_dimension_numbers<[1], [0], [0], [1], [0, 0, 1, 1], [], []>} : vector<32x128xf32>, vector<128x8xf32>, vector<32x8xf32> -> vector<32x8xf32>
    %c6_53 = arith.constant 6 : index
    %c0_54 = arith.constant 0 : index
    %c0_55 = arith.constant 0 : index
    %55 = vector.load %arg4[%c6_53, %c0_54, %c0_55] : memref<16x8x16xf32, #tpu.memory_space<vmem>>, vector<1x8x16xf32>
    %56 = vector.shape_cast %55 : vector<1x8x16xf32> to vector<8x16xf32>
    %cst_56 = arith.constant dense<0.000000e+00> : vector<32x16xf32>
    %57 = tpu.matmul %54, %56, %cst_56 {dimension_numbers = #tpu.dot_dimension_numbers<[1], [0], [0], [1], [0, 0, 1, 1], [], []>} : vector<32x8xf32>, vector<8x16xf32>, vector<32x16xf32> -> vector<32x16xf32>
    %58 = arith.addf %51, %57 : vector<32x16xf32>
    %c7 = arith.constant 7 : index
    %c0_57 = arith.constant 0 : index
    %c0_58 = arith.constant 0 : index
    %59 = vector.load %arg3[%c7, %c0_57, %c0_58] : memref<16x32x128xf32, #tpu.memory_space<vmem>>, vector<1x32x128xf32>
    %60 = vector.shape_cast %59 : vector<1x32x128xf32> to vector<32x128xf32>
    %cst_59 = arith.constant dense<0.000000e+00> : vector<32x8xf32>
    %61 = tpu.matmul %60, %8, %cst_59 {dimension_numbers = #tpu.dot_dimension_numbers<[1], [0], [0], [1], [0, 0, 1, 1], [], []>} : vector<32x128xf32>, vector<128x8xf32>, vector<32x8xf32> -> vector<32x8xf32>
    %c7_60 = arith.constant 7 : index
    %c0_61 = arith.constant 0 : index
    %c0_62 = arith.constant 0 : index
    %62 = vector.load %arg4[%c7_60, %c0_61, %c0_62] : memref<16x8x16xf32, #tpu.memory_space<vmem>>, vector<1x8x16xf32>
    %63 = vector.shape_cast %62 : vector<1x8x16xf32> to vector<8x16xf32>
    %cst_63 = arith.constant dense<0.000000e+00> : vector<32x16xf32>
    %64 = tpu.matmul %61, %63, %cst_63 {dimension_numbers = #tpu.dot_dimension_numbers<[1], [0], [0], [1], [0, 0, 1, 1], [], []>} : vector<32x8xf32>, vector<8x16xf32>, vector<32x16xf32> -> vector<32x16xf32>
    %65 = arith.addf %58, %64 : vector<32x16xf32>
    %c8 = arith.constant 8 : index
    %c0_64 = arith.constant 0 : index
    %c0_65 = arith.constant 0 : index
    %66 = vector.load %arg3[%c8, %c0_64, %c0_65] : memref<16x32x128xf32, #tpu.memory_space<vmem>>, vector<1x32x128xf32>
    %67 = vector.shape_cast %66 : vector<1x32x128xf32> to vector<32x128xf32>
    %cst_66 = arith.constant dense<0.000000e+00> : vector<32x8xf32>
    %68 = tpu.matmul %67, %8, %cst_66 {dimension_numbers = #tpu.dot_dimension_numbers<[1], [0], [0], [1], [0, 0, 1, 1], [], []>} : vector<32x128xf32>, vector<128x8xf32>, vector<32x8xf32> -> vector<32x8xf32>
    %c8_67 = arith.constant 8 : index
    %c0_68 = arith.constant 0 : index
    %c0_69 = arith.constant 0 : index
    %69 = vector.load %arg4[%c8_67, %c0_68, %c0_69] : memref<16x8x16xf32, #tpu.memory_space<vmem>>, vector<1x8x16xf32>
    %70 = vector.shape_cast %69 : vector<1x8x16xf32> to vector<8x16xf32>
    %cst_70 = arith.constant dense<0.000000e+00> : vector<32x16xf32>
    %71 = tpu.matmul %68, %70, %cst_70 {dimension_numbers = #tpu.dot_dimension_numbers<[1], [0], [0], [1], [0, 0, 1, 1], [], []>} : vector<32x8xf32>, vector<8x16xf32>, vector<32x16xf32> -> vector<32x16xf32>
    %72 = arith.addf %65, %71 : vector<32x16xf32>
    %c9 = arith.constant 9 : index
    %c0_71 = arith.constant 0 : index
    %c0_72 = arith.constant 0 : index
    %73 = vector.load %arg3[%c9, %c0_71, %c0_72] : memref<16x32x128xf32, #tpu.memory_space<vmem>>, vector<1x32x128xf32>
    %74 = vector.shape_cast %73 : vector<1x32x128xf32> to vector<32x128xf32>
    %cst_73 = arith.constant dense<0.000000e+00> : vector<32x8xf32>
    %75 = tpu.matmul %74, %8, %cst_73 {dimension_numbers = #tpu.dot_dimension_numbers<[1], [0], [0], [1], [0, 0, 1, 1], [], []>} : vector<32x128xf32>, vector<128x8xf32>, vector<32x8xf32> -> vector<32x8xf32>
    %c9_74 = arith.constant 9 : index
    %c0_75 = arith.constant 0 : index
    %c0_76 = arith.constant 0 : index
    %76 = vector.load %arg4[%c9_74, %c0_75, %c0_76] : memref<16x8x16xf32, #tpu.memory_space<vmem>>, vector<1x8x16xf32>
    %77 = vector.shape_cast %76 : vector<1x8x16xf32> to vector<8x16xf32>
    %cst_77 = arith.constant dense<0.000000e+00> : vector<32x16xf32>
    %78 = tpu.matmul %75, %77, %cst_77 {dimension_numbers = #tpu.dot_dimension_numbers<[1], [0], [0], [1], [0, 0, 1, 1], [], []>} : vector<32x8xf32>, vector<8x16xf32>, vector<32x16xf32> -> vector<32x16xf32>
    %79 = arith.addf %72, %78 : vector<32x16xf32>
    %c10 = arith.constant 10 : index
    %c0_78 = arith.constant 0 : index
    %c0_79 = arith.constant 0 : index
    %80 = vector.load %arg3[%c10, %c0_78, %c0_79] : memref<16x32x128xf32, #tpu.memory_space<vmem>>, vector<1x32x128xf32>
    %81 = vector.shape_cast %80 : vector<1x32x128xf32> to vector<32x128xf32>
    %cst_80 = arith.constant dense<0.000000e+00> : vector<32x8xf32>
    %82 = tpu.matmul %81, %8, %cst_80 {dimension_numbers = #tpu.dot_dimension_numbers<[1], [0], [0], [1], [0, 0, 1, 1], [], []>} : vector<32x128xf32>, vector<128x8xf32>, vector<32x8xf32> -> vector<32x8xf32>
    %c10_81 = arith.constant 10 : index
    %c0_82 = arith.constant 0 : index
    %c0_83 = arith.constant 0 : index
    %83 = vector.load %arg4[%c10_81, %c0_82, %c0_83] : memref<16x8x16xf32, #tpu.memory_space<vmem>>, vector<1x8x16xf32>
    %84 = vector.shape_cast %83 : vector<1x8x16xf32> to vector<8x16xf32>
    %cst_84 = arith.constant dense<0.000000e+00> : vector<32x16xf32>
    %85 = tpu.matmul %82, %84, %cst_84 {dimension_numbers = #tpu.dot_dimension_numbers<[1], [0], [0], [1], [0, 0, 1, 1], [], []>} : vector<32x8xf32>, vector<8x16xf32>, vector<32x16xf32> -> vector<32x16xf32>
    %86 = arith.addf %79, %85 : vector<32x16xf32>
    %c11 = arith.constant 11 : index
    %c0_85 = arith.constant 0 : index
    %c0_86 = arith.constant 0 : index
    %87 = vector.load %arg3[%c11, %c0_85, %c0_86] : memref<16x32x128xf32, #tpu.memory_space<vmem>>, vector<1x32x128xf32>
    %88 = vector.shape_cast %87 : vector<1x32x128xf32> to vector<32x128xf32>
    %cst_87 = arith.constant dense<0.000000e+00> : vector<32x8xf32>
    %89 = tpu.matmul %88, %8, %cst_87 {dimension_numbers = #tpu.dot_dimension_numbers<[1], [0], [0], [1], [0, 0, 1, 1], [], []>} : vector<32x128xf32>, vector<128x8xf32>, vector<32x8xf32> -> vector<32x8xf32>
    %c11_88 = arith.constant 11 : index
    %c0_89 = arith.constant 0 : index
    %c0_90 = arith.constant 0 : index
    %90 = vector.load %arg4[%c11_88, %c0_89, %c0_90] : memref<16x8x16xf32, #tpu.memory_space<vmem>>, vector<1x8x16xf32>
    %91 = vector.shape_cast %90 : vector<1x8x16xf32> to vector<8x16xf32>
    %cst_91 = arith.constant dense<0.000000e+00> : vector<32x16xf32>
    %92 = tpu.matmul %89, %91, %cst_91 {dimension_numbers = #tpu.dot_dimension_numbers<[1], [0], [0], [1], [0, 0, 1, 1], [], []>} : vector<32x8xf32>, vector<8x16xf32>, vector<32x16xf32> -> vector<32x16xf32>
    %93 = arith.addf %86, %92 : vector<32x16xf32>
    %c12 = arith.constant 12 : index
    %c0_92 = arith.constant 0 : index
    %c0_93 = arith.constant 0 : index
    %94 = vector.load %arg3[%c12, %c0_92, %c0_93] : memref<16x32x128xf32, #tpu.memory_space<vmem>>, vector<1x32x128xf32>
    %95 = vector.shape_cast %94 : vector<1x32x128xf32> to vector<32x128xf32>
    %cst_94 = arith.constant dense<0.000000e+00> : vector<32x8xf32>
    %96 = tpu.matmul %95, %8, %cst_94 {dimension_numbers = #tpu.dot_dimension_numbers<[1], [0], [0], [1], [0, 0, 1, 1], [], []>} : vector<32x128xf32>, vector<128x8xf32>, vector<32x8xf32> -> vector<32x8xf32>
    %c12_95 = arith.constant 12 : index
    %c0_96 = arith.constant 0 : index
    %c0_97 = arith.constant 0 : index
    %97 = vector.load %arg4[%c12_95, %c0_96, %c0_97] : memref<16x8x16xf32, #tpu.memory_space<vmem>>, vector<1x8x16xf32>
    %98 = vector.shape_cast %97 : vector<1x8x16xf32> to vector<8x16xf32>
    %cst_98 = arith.constant dense<0.000000e+00> : vector<32x16xf32>
    %99 = tpu.matmul %96, %98, %cst_98 {dimension_numbers = #tpu.dot_dimension_numbers<[1], [0], [0], [1], [0, 0, 1, 1], [], []>} : vector<32x8xf32>, vector<8x16xf32>, vector<32x16xf32> -> vector<32x16xf32>
    %100 = arith.addf %93, %99 : vector<32x16xf32>
    %c13 = arith.constant 13 : index
    %c0_99 = arith.constant 0 : index
    %c0_100 = arith.constant 0 : index
    %101 = vector.load %arg3[%c13, %c0_99, %c0_100] : memref<16x32x128xf32, #tpu.memory_space<vmem>>, vector<1x32x128xf32>
    %102 = vector.shape_cast %101 : vector<1x32x128xf32> to vector<32x128xf32>
    %cst_101 = arith.constant dense<0.000000e+00> : vector<32x8xf32>
    %103 = tpu.matmul %102, %8, %cst_101 {dimension_numbers = #tpu.dot_dimension_numbers<[1], [0], [0], [1], [0, 0, 1, 1], [], []>} : vector<32x128xf32>, vector<128x8xf32>, vector<32x8xf32> -> vector<32x8xf32>
    %c13_102 = arith.constant 13 : index
    %c0_103 = arith.constant 0 : index
    %c0_104 = arith.constant 0 : index
    %104 = vector.load %arg4[%c13_102, %c0_103, %c0_104] : memref<16x8x16xf32, #tpu.memory_space<vmem>>, vector<1x8x16xf32>
    %105 = vector.shape_cast %104 : vector<1x8x16xf32> to vector<8x16xf32>
    %cst_105 = arith.constant dense<0.000000e+00> : vector<32x16xf32>
    %106 = tpu.matmul %103, %105, %cst_105 {dimension_numbers = #tpu.dot_dimension_numbers<[1], [0], [0], [1], [0, 0, 1, 1], [], []>} : vector<32x8xf32>, vector<8x16xf32>, vector<32x16xf32> -> vector<32x16xf32>
    %107 = arith.addf %100, %106 : vector<32x16xf32>
    %c14 = arith.constant 14 : index
    %c0_106 = arith.constant 0 : index
    %c0_107 = arith.constant 0 : index
    %108 = vector.load %arg3[%c14, %c0_106, %c0_107] : memref<16x32x128xf32, #tpu.memory_space<vmem>>, vector<1x32x128xf32>
    %109 = vector.shape_cast %108 : vector<1x32x128xf32> to vector<32x128xf32>
    %cst_108 = arith.constant dense<0.000000e+00> : vector<32x8xf32>
    %110 = tpu.matmul %109, %8, %cst_108 {dimension_numbers = #tpu.dot_dimension_numbers<[1], [0], [0], [1], [0, 0, 1, 1], [], []>} : vector<32x128xf32>, vector<128x8xf32>, vector<32x8xf32> -> vector<32x8xf32>
    %c14_109 = arith.constant 14 : index
    %c0_110 = arith.constant 0 : index
    %c0_111 = arith.constant 0 : index
    %111 = vector.load %arg4[%c14_109, %c0_110, %c0_111] : memref<16x8x16xf32, #tpu.memory_space<vmem>>, vector<1x8x16xf32>
    %112 = vector.shape_cast %111 : vector<1x8x16xf32> to vector<8x16xf32>
    %cst_112 = arith.constant dense<0.000000e+00> : vector<32x16xf32>
    %113 = tpu.matmul %110, %112, %cst_112 {dimension_numbers = #tpu.dot_dimension_numbers<[1], [0], [0], [1], [0, 0, 1, 1], [], []>} : vector<32x8xf32>, vector<8x16xf32>, vector<32x16xf32> -> vector<32x16xf32>
    %114 = arith.addf %107, %113 : vector<32x16xf32>
    %c15 = arith.constant 15 : index
    %c0_113 = arith.constant 0 : index
    %c0_114 = arith.constant 0 : index
    %115 = vector.load %arg3[%c15, %c0_113, %c0_114] : memref<16x32x128xf32, #tpu.memory_space<vmem>>, vector<1x32x128xf32>
    %116 = vector.shape_cast %115 : vector<1x32x128xf32> to vector<32x128xf32>
    %cst_115 = arith.constant dense<0.000000e+00> : vector<32x8xf32>
    %117 = tpu.matmul %116, %8, %cst_115 {dimension_numbers = #tpu.dot_dimension_numbers<[1], [0], [0], [1], [0, 0, 1, 1], [], []>} : vector<32x128xf32>, vector<128x8xf32>, vector<32x8xf32> -> vector<32x8xf32>
    %c15_116 = arith.constant 15 : index
    %c0_117 = arith.constant 0 : index
    %c0_118 = arith.constant 0 : index
    %118 = vector.load %arg4[%c15_116, %c0_117, %c0_118] : memref<16x8x16xf32, #tpu.memory_space<vmem>>, vector<1x8x16xf32>
    %119 = vector.shape_cast %118 : vector<1x8x16xf32> to vector<8x16xf32>
    %cst_119 = arith.constant dense<0.000000e+00> : vector<32x16xf32>
    %120 = tpu.matmul %117, %119, %cst_119 {dimension_numbers = #tpu.dot_dimension_numbers<[1], [0], [0], [1], [0, 0, 1, 1], [], []>} : vector<32x8xf32>, vector<8x16xf32>, vector<32x16xf32> -> vector<32x16xf32>
    %121 = arith.addf %114, %120 : vector<32x16xf32>
    %cst_120 = arith.constant dense<0.000000e+00> : vector<16xf32>
    %122 = vector.multi_reduction <add>, %121, %cst_120 [0] : vector<32x16xf32> to vector<16xf32>
    %123 = vector.shape_cast %122 : vector<16xf32> to vector<1x16xf32>
    %cst_121 = arith.constant 3.200000e+01 : f32
    %124 = vector.broadcast %cst_121 : f32 to vector<1x16xf32>
    %125 = arith.divf %123, %124 : vector<1x16xf32>
    %126 = vector.broadcast %125 : vector<1x16xf32> to vector<32x16xf32>
    %127 = arith.subf %121, %126 : vector<32x16xf32>
    %128 = arith.mulf %127, %127 : vector<32x16xf32>
    %cst_122 = arith.constant dense<0.000000e+00> : vector<16xf32>
    %129 = vector.multi_reduction <add>, %128, %cst_122 [0] : vector<32x16xf32> to vector<16xf32>
    %130 = vector.shape_cast %129 : vector<16xf32> to vector<1x16xf32>
    %cst_123 = arith.constant 3.200000e+01 : f32
    %131 = vector.broadcast %cst_123 : f32 to vector<1x16xf32>
    %132 = arith.divf %130, %131 : vector<1x16xf32>
    %133 = vector.broadcast %125 : vector<1x16xf32> to vector<32x16xf32>
    %134 = arith.subf %121, %133 : vector<32x16xf32>
    %cst_124 = arith.constant 9.99999974E-6 : f32
    %135 = vector.broadcast %cst_124 : f32 to vector<1x16xf32>
    %136 = arith.addf %132, %135 : vector<1x16xf32>
    %137 = math.rsqrt %136 : vector<1x16xf32>
    %138 = vector.broadcast %137 : vector<1x16xf32> to vector<32x16xf32>
    %139 = arith.mulf %134, %138 : vector<32x16xf32>
    %c0_125 = arith.constant 0 : index
    %c0_126 = arith.constant 0 : index
    %140 = vector.load %arg5[%c0_125, %c0_126] : memref<1x16xf32, #tpu.memory_space<vmem>>, vector<1x16xf32>
    %141 = vector.broadcast %140 : vector<1x16xf32> to vector<32x16xf32>
    %142 = arith.mulf %139, %141 : vector<32x16xf32>
    %c0_127 = arith.constant 0 : index
    %c0_128 = arith.constant 0 : index
    %143 = vector.load %arg6[%c0_127, %c0_128] : memref<1x16xf32, #tpu.memory_space<vmem>>, vector<1x16xf32>
    %144 = vector.broadcast %143 : vector<1x16xf32> to vector<32x16xf32>
    %145 = arith.addf %142, %144 : vector<32x16xf32>
    %cst_129 = arith.constant 2.000000e-01 : f32
    %146 = vector.broadcast %cst_129 : f32 to vector<32x16xf32>
    %147 = arith.mulf %146, %145 : vector<32x16xf32>
    %148 = arith.maximumf %145, %147 : vector<32x16xf32>
    %cst_130 = arith.constant 0.000000e+00 : f32
    %149 = vector.broadcast %cst_130 : f32 to vector<2x128xf32>
    %150 = vector.extract_strided_slice %148 {offsets = [0, 0], sizes = [2, 16], strides = [1, 1]} : vector<32x16xf32> to vector<2x16xf32>
    %c0_131 = arith.constant 0 : index
    %c0_132 = arith.constant 0 : index
    %c0_133 = arith.constant 0 : index
    %151 = vector.load %arg7[%c0_131, %c0_132, %c0_133] : memref<16x16x128xf32, #tpu.memory_space<vmem>>, vector<1x16x128xf32>
    %152 = vector.shape_cast %151 : vector<1x16x128xf32> to vector<16x128xf32>
    %cst_134 = arith.constant dense<0.000000e+00> : vector<2x128xf32>
    %153 = tpu.matmul %150, %152, %cst_134 {dimension_numbers = #tpu.dot_dimension_numbers<[1], [0], [0], [1], [0, 0, 1, 1], [], []>} : vector<2x16xf32>, vector<16x128xf32>, vector<2x128xf32> -> vector<2x128xf32>
    %154 = arith.addf %149, %153 : vector<2x128xf32>
    %155 = vector.extract_strided_slice %148 {offsets = [2, 0], sizes = [2, 16], strides = [1, 1]} : vector<32x16xf32> to vector<2x16xf32>
    %c1_135 = arith.constant 1 : index
    %c0_136 = arith.constant 0 : index
    %c0_137 = arith.constant 0 : index
    %156 = vector.load %arg7[%c1_135, %c0_136, %c0_137] : memref<16x16x128xf32, #tpu.memory_space<vmem>>, vector<1x16x128xf32>
    %157 = vector.shape_cast %156 : vector<1x16x128xf32> to vector<16x128xf32>
    %cst_138 = arith.constant dense<0.000000e+00> : vector<2x128xf32>
    %158 = tpu.matmul %155, %157, %cst_138 {dimension_numbers = #tpu.dot_dimension_numbers<[1], [0], [0], [1], [0, 0, 1, 1], [], []>} : vector<2x16xf32>, vector<16x128xf32>, vector<2x128xf32> -> vector<2x128xf32>
    %159 = arith.addf %154, %158 : vector<2x128xf32>
    %160 = vector.extract_strided_slice %148 {offsets = [4, 0], sizes = [2, 16], strides = [1, 1]} : vector<32x16xf32> to vector<2x16xf32>
    %c2_139 = arith.constant 2 : index
    %c0_140 = arith.constant 0 : index
    %c0_141 = arith.constant 0 : index
    %161 = vector.load %arg7[%c2_139, %c0_140, %c0_141] : memref<16x16x128xf32, #tpu.memory_space<vmem>>, vector<1x16x128xf32>
    %162 = vector.shape_cast %161 : vector<1x16x128xf32> to vector<16x128xf32>
    %cst_142 = arith.constant dense<0.000000e+00> : vector<2x128xf32>
    %163 = tpu.matmul %160, %162, %cst_142 {dimension_numbers = #tpu.dot_dimension_numbers<[1], [0], [0], [1], [0, 0, 1, 1], [], []>} : vector<2x16xf32>, vector<16x128xf32>, vector<2x128xf32> -> vector<2x128xf32>
    %164 = arith.addf %159, %163 : vector<2x128xf32>
    %165 = vector.extract_strided_slice %148 {offsets = [6, 0], sizes = [2, 16], strides = [1, 1]} : vector<32x16xf32> to vector<2x16xf32>
    %c3_143 = arith.constant 3 : index
    %c0_144 = arith.constant 0 : index
    %c0_145 = arith.constant 0 : index
    %166 = vector.load %arg7[%c3_143, %c0_144, %c0_145] : memref<16x16x128xf32, #tpu.memory_space<vmem>>, vector<1x16x128xf32>
    %167 = vector.shape_cast %166 : vector<1x16x128xf32> to vector<16x128xf32>
    %cst_146 = arith.constant dense<0.000000e+00> : vector<2x128xf32>
    %168 = tpu.matmul %165, %167, %cst_146 {dimension_numbers = #tpu.dot_dimension_numbers<[1], [0], [0], [1], [0, 0, 1, 1], [], []>} : vector<2x16xf32>, vector<16x128xf32>, vector<2x128xf32> -> vector<2x128xf32>
    %169 = arith.addf %164, %168 : vector<2x128xf32>
    %170 = vector.extract_strided_slice %148 {offsets = [8, 0], sizes = [2, 16], strides = [1, 1]} : vector<32x16xf32> to vector<2x16xf32>
    %c4_147 = arith.constant 4 : index
    %c0_148 = arith.constant 0 : index
    %c0_149 = arith.constant 0 : index
    %171 = vector.load %arg7[%c4_147, %c0_148, %c0_149] : memref<16x16x128xf32, #tpu.memory_space<vmem>>, vector<1x16x128xf32>
    %172 = vector.shape_cast %171 : vector<1x16x128xf32> to vector<16x128xf32>
    %cst_150 = arith.constant dense<0.000000e+00> : vector<2x128xf32>
    %173 = tpu.matmul %170, %172, %cst_150 {dimension_numbers = #tpu.dot_dimension_numbers<[1], [0], [0], [1], [0, 0, 1, 1], [], []>} : vector<2x16xf32>, vector<16x128xf32>, vector<2x128xf32> -> vector<2x128xf32>
    %174 = arith.addf %169, %173 : vector<2x128xf32>
    %175 = vector.extract_strided_slice %148 {offsets = [10, 0], sizes = [2, 16], strides = [1, 1]} : vector<32x16xf32> to vector<2x16xf32>
    %c5_151 = arith.constant 5 : index
    %c0_152 = arith.constant 0 : index
    %c0_153 = arith.constant 0 : index
    %176 = vector.load %arg7[%c5_151, %c0_152, %c0_153] : memref<16x16x128xf32, #tpu.memory_space<vmem>>, vector<1x16x128xf32>
    %177 = vector.shape_cast %176 : vector<1x16x128xf32> to vector<16x128xf32>
    %cst_154 = arith.constant dense<0.000000e+00> : vector<2x128xf32>
    %178 = tpu.matmul %175, %177, %cst_154 {dimension_numbers = #tpu.dot_dimension_numbers<[1], [0], [0], [1], [0, 0, 1, 1], [], []>} : vector<2x16xf32>, vector<16x128xf32>, vector<2x128xf32> -> vector<2x128xf32>
    %179 = arith.addf %174, %178 : vector<2x128xf32>
    %180 = vector.extract_strided_slice %148 {offsets = [12, 0], sizes = [2, 16], strides = [1, 1]} : vector<32x16xf32> to vector<2x16xf32>
    %c6_155 = arith.constant 6 : index
    %c0_156 = arith.constant 0 : index
    %c0_157 = arith.constant 0 : index
    %181 = vector.load %arg7[%c6_155, %c0_156, %c0_157] : memref<16x16x128xf32, #tpu.memory_space<vmem>>, vector<1x16x128xf32>
    %182 = vector.shape_cast %181 : vector<1x16x128xf32> to vector<16x128xf32>
    %cst_158 = arith.constant dense<0.000000e+00> : vector<2x128xf32>
    %183 = tpu.matmul %180, %182, %cst_158 {dimension_numbers = #tpu.dot_dimension_numbers<[1], [0], [0], [1], [0, 0, 1, 1], [], []>} : vector<2x16xf32>, vector<16x128xf32>, vector<2x128xf32> -> vector<2x128xf32>
    %184 = arith.addf %179, %183 : vector<2x128xf32>
    %185 = vector.extract_strided_slice %148 {offsets = [14, 0], sizes = [2, 16], strides = [1, 1]} : vector<32x16xf32> to vector<2x16xf32>
    %c7_159 = arith.constant 7 : index
    %c0_160 = arith.constant 0 : index
    %c0_161 = arith.constant 0 : index
    %186 = vector.load %arg7[%c7_159, %c0_160, %c0_161] : memref<16x16x128xf32, #tpu.memory_space<vmem>>, vector<1x16x128xf32>
    %187 = vector.shape_cast %186 : vector<1x16x128xf32> to vector<16x128xf32>
    %cst_162 = arith.constant dense<0.000000e+00> : vector<2x128xf32>
    %188 = tpu.matmul %185, %187, %cst_162 {dimension_numbers = #tpu.dot_dimension_numbers<[1], [0], [0], [1], [0, 0, 1, 1], [], []>} : vector<2x16xf32>, vector<16x128xf32>, vector<2x128xf32> -> vector<2x128xf32>
    %189 = arith.addf %184, %188 : vector<2x128xf32>
    %190 = vector.extract_strided_slice %148 {offsets = [16, 0], sizes = [2, 16], strides = [1, 1]} : vector<32x16xf32> to vector<2x16xf32>
    %c8_163 = arith.constant 8 : index
    %c0_164 = arith.constant 0 : index
    %c0_165 = arith.constant 0 : index
    %191 = vector.load %arg7[%c8_163, %c0_164, %c0_165] : memref<16x16x128xf32, #tpu.memory_space<vmem>>, vector<1x16x128xf32>
    %192 = vector.shape_cast %191 : vector<1x16x128xf32> to vector<16x128xf32>
    %cst_166 = arith.constant dense<0.000000e+00> : vector<2x128xf32>
    %193 = tpu.matmul %190, %192, %cst_166 {dimension_numbers = #tpu.dot_dimension_numbers<[1], [0], [0], [1], [0, 0, 1, 1], [], []>} : vector<2x16xf32>, vector<16x128xf32>, vector<2x128xf32> -> vector<2x128xf32>
    %194 = arith.addf %189, %193 : vector<2x128xf32>
    %195 = vector.extract_strided_slice %148 {offsets = [18, 0], sizes = [2, 16], strides = [1, 1]} : vector<32x16xf32> to vector<2x16xf32>
    %c9_167 = arith.constant 9 : index
    %c0_168 = arith.constant 0 : index
    %c0_169 = arith.constant 0 : index
    %196 = vector.load %arg7[%c9_167, %c0_168, %c0_169] : memref<16x16x128xf32, #tpu.memory_space<vmem>>, vector<1x16x128xf32>
    %197 = vector.shape_cast %196 : vector<1x16x128xf32> to vector<16x128xf32>
    %cst_170 = arith.constant dense<0.000000e+00> : vector<2x128xf32>
    %198 = tpu.matmul %195, %197, %cst_170 {dimension_numbers = #tpu.dot_dimension_numbers<[1], [0], [0], [1], [0, 0, 1, 1], [], []>} : vector<2x16xf32>, vector<16x128xf32>, vector<2x128xf32> -> vector<2x128xf32>
    %199 = arith.addf %194, %198 : vector<2x128xf32>
    %200 = vector.extract_strided_slice %148 {offsets = [20, 0], sizes = [2, 16], strides = [1, 1]} : vector<32x16xf32> to vector<2x16xf32>
    %c10_171 = arith.constant 10 : index
    %c0_172 = arith.constant 0 : index
    %c0_173 = arith.constant 0 : index
    %201 = vector.load %arg7[%c10_171, %c0_172, %c0_173] : memref<16x16x128xf32, #tpu.memory_space<vmem>>, vector<1x16x128xf32>
    %202 = vector.shape_cast %201 : vector<1x16x128xf32> to vector<16x128xf32>
    %cst_174 = arith.constant dense<0.000000e+00> : vector<2x128xf32>
    %203 = tpu.matmul %200, %202, %cst_174 {dimension_numbers = #tpu.dot_dimension_numbers<[1], [0], [0], [1], [0, 0, 1, 1], [], []>} : vector<2x16xf32>, vector<16x128xf32>, vector<2x128xf32> -> vector<2x128xf32>
    %204 = arith.addf %199, %203 : vector<2x128xf32>
    %205 = vector.extract_strided_slice %148 {offsets = [22, 0], sizes = [2, 16], strides = [1, 1]} : vector<32x16xf32> to vector<2x16xf32>
    %c11_175 = arith.constant 11 : index
    %c0_176 = arith.constant 0 : index
    %c0_177 = arith.constant 0 : index
    %206 = vector.load %arg7[%c11_175, %c0_176, %c0_177] : memref<16x16x128xf32, #tpu.memory_space<vmem>>, vector<1x16x128xf32>
    %207 = vector.shape_cast %206 : vector<1x16x128xf32> to vector<16x128xf32>
    %cst_178 = arith.constant dense<0.000000e+00> : vector<2x128xf32>
    %208 = tpu.matmul %205, %207, %cst_178 {dimension_numbers = #tpu.dot_dimension_numbers<[1], [0], [0], [1], [0, 0, 1, 1], [], []>} : vector<2x16xf32>, vector<16x128xf32>, vector<2x128xf32> -> vector<2x128xf32>
    %209 = arith.addf %204, %208 : vector<2x128xf32>
    %210 = vector.extract_strided_slice %148 {offsets = [24, 0], sizes = [2, 16], strides = [1, 1]} : vector<32x16xf32> to vector<2x16xf32>
    %c12_179 = arith.constant 12 : index
    %c0_180 = arith.constant 0 : index
    %c0_181 = arith.constant 0 : index
    %211 = vector.load %arg7[%c12_179, %c0_180, %c0_181] : memref<16x16x128xf32, #tpu.memory_space<vmem>>, vector<1x16x128xf32>
    %212 = vector.shape_cast %211 : vector<1x16x128xf32> to vector<16x128xf32>
    %cst_182 = arith.constant dense<0.000000e+00> : vector<2x128xf32>
    %213 = tpu.matmul %210, %212, %cst_182 {dimension_numbers = #tpu.dot_dimension_numbers<[1], [0], [0], [1], [0, 0, 1, 1], [], []>} : vector<2x16xf32>, vector<16x128xf32>, vector<2x128xf32> -> vector<2x128xf32>
    %214 = arith.addf %209, %213 : vector<2x128xf32>
    %215 = vector.extract_strided_slice %148 {offsets = [26, 0], sizes = [2, 16], strides = [1, 1]} : vector<32x16xf32> to vector<2x16xf32>
    %c13_183 = arith.constant 13 : index
    %c0_184 = arith.constant 0 : index
    %c0_185 = arith.constant 0 : index
    %216 = vector.load %arg7[%c13_183, %c0_184, %c0_185] : memref<16x16x128xf32, #tpu.memory_space<vmem>>, vector<1x16x128xf32>
    %217 = vector.shape_cast %216 : vector<1x16x128xf32> to vector<16x128xf32>
    %cst_186 = arith.constant dense<0.000000e+00> : vector<2x128xf32>
    %218 = tpu.matmul %215, %217, %cst_186 {dimension_numbers = #tpu.dot_dimension_numbers<[1], [0], [0], [1], [0, 0, 1, 1], [], []>} : vector<2x16xf32>, vector<16x128xf32>, vector<2x128xf32> -> vector<2x128xf32>
    %219 = arith.addf %214, %218 : vector<2x128xf32>
    %220 = vector.extract_strided_slice %148 {offsets = [28, 0], sizes = [2, 16], strides = [1, 1]} : vector<32x16xf32> to vector<2x16xf32>
    %c14_187 = arith.constant 14 : index
    %c0_188 = arith.constant 0 : index
    %c0_189 = arith.constant 0 : index
    %221 = vector.load %arg7[%c14_187, %c0_188, %c0_189] : memref<16x16x128xf32, #tpu.memory_space<vmem>>, vector<1x16x128xf32>
    %222 = vector.shape_cast %221 : vector<1x16x128xf32> to vector<16x128xf32>
    %cst_190 = arith.constant dense<0.000000e+00> : vector<2x128xf32>
    %223 = tpu.matmul %220, %222, %cst_190 {dimension_numbers = #tpu.dot_dimension_numbers<[1], [0], [0], [1], [0, 0, 1, 1], [], []>} : vector<2x16xf32>, vector<16x128xf32>, vector<2x128xf32> -> vector<2x128xf32>
    %224 = arith.addf %219, %223 : vector<2x128xf32>
    %225 = vector.extract_strided_slice %148 {offsets = [30, 0], sizes = [2, 16], strides = [1, 1]} : vector<32x16xf32> to vector<2x16xf32>
    %c15_191 = arith.constant 15 : index
    %c0_192 = arith.constant 0 : index
    %c0_193 = arith.constant 0 : index
    %226 = vector.load %arg7[%c15_191, %c0_192, %c0_193] : memref<16x16x128xf32, #tpu.memory_space<vmem>>, vector<1x16x128xf32>
    %227 = vector.shape_cast %226 : vector<1x16x128xf32> to vector<16x128xf32>
    %cst_194 = arith.constant dense<0.000000e+00> : vector<2x128xf32>
    %228 = tpu.matmul %225, %227, %cst_194 {dimension_numbers = #tpu.dot_dimension_numbers<[1], [0], [0], [1], [0, 0, 1, 1], [], []>} : vector<2x16xf32>, vector<16x128xf32>, vector<2x128xf32> -> vector<2x128xf32>
    %229 = arith.addf %224, %228 : vector<2x128xf32>
    %c0_195 = arith.constant 0 : index
    %c0_196 = arith.constant 0 : index
    %230 = vector.load %arg8[%c0_195, %c0_196] : memref<1x128xf32, #tpu.memory_space<vmem>>, vector<1x128xf32>
    %231 = vector.broadcast %230 : vector<1x128xf32> to vector<2x128xf32>
    %232 = arith.addf %229, %231 : vector<2x128xf32>
    %cst_197 = arith.constant 0.000000e+00 : f32
    %233 = vector.broadcast %cst_197 : f32 to vector<2x128xf32>
    %234 = arith.subf %233, %232 : vector<2x128xf32>
    %235 = math.exp %234 : vector<2x128xf32>
    %cst_198 = arith.constant 1.000000e+00 : f32
    %236 = vector.broadcast %cst_198 : f32 to vector<2x128xf32>
    %237 = arith.addf %236, %235 : vector<2x128xf32>
    %cst_199 = arith.constant 1.000000e+00 : f32
    %238 = vector.broadcast %cst_199 : f32 to vector<2x128xf32>
    %239 = arith.divf %238, %237 : vector<2x128xf32>
    %c0_200 = arith.constant 0 : index
    %c0_201 = arith.constant 0 : index
    %240 = vector.load %arg9[%c0_200, %c0_201] : memref<2x128xf32, #tpu.memory_space<vmem>>, vector<2x128xf32>
    tpu.vector_store %arg9[%c0_200, %c0_201], %239 {strides = array<i32>} : memref<2x128xf32, #tpu.memory_space<vmem>>, vector<2x128xf32>,
    return
  }
}

</mosaic_0001>

<bundles_post_ra>
// kernel: discriminator_forward.1
= control target key start
LH: loop header
LB: loop body
LE: loop exit
PB: predicated region body
PF: predicated region fallthrough
CT: control target
= control target key end

     0   :  { %vm63_vm0 = vcmask 523264   ;;  %vm471_vm1 = vcmask 64512   ;;  %vm6901_vm2 = vmmov 0   ;;  %vm3368_vm3 = vcmask 130048   ;;  %s7855_s1 = inlined_call_operand.vmem [shape: f32[64,8], index: 1, kind: input, shape index: {}]   ;;  %s7856_s0 = inlined_call_operand.vmem [shape: f32[128,64], index: 0, kind: input, shape index: {}]   ;;  %s7857_s3 = inlined_call_operand.vmem [shape: f32[16,32,128], index: 3, kind: input, shape index: {}]   ;;  %s7858_s2 = inlined_call_operand.vmem [shape: f32[1,8], index: 2, kind: input, shape index: {}]   ;;  %s7859_s4 = inlined_call_operand.vmem [shape: f32[16,8,16], index: 4, kind: input, shape index: {}]   ;;  %s7860_s7 = inlined_call_operand.vmem [shape: f32[16,16,128], index: 7, kind: input, shape index: {}]   ;;  %s7861_s5 = inlined_call_operand.vmem [shape: f32[1,16], index: 5, kind: input, shape index: {}]   ;;  %s7862_s6 = inlined_call_operand.vmem [shape: f32[1,16], index: 6, kind: input, shape index: {}]   ;;  %s7863_s8 = inlined_call_operand.vmem [shape: f32[1,128], index: 8, kind: input, shape index: {}]   ;;  %s7864_s9 = inlined_call_operand.vmem [shape: f32[2,128], index: 9, kind: output, shape index: {}]  }
   0x1   :  { %v48_v0 = vld [vmem:[%s7855_s1] sm:$0xff]  ;;  %v49_v1 = vld [vmem:[%s7855_s1 + $0x8] sm:$0xff]  ;;  %v50_v2 = vld [vmem:[%s7855_s1 + $0x10] sm:$0xff] }
   0x2   :  { %v6255_v3 = vpack.c.bf16 %v49_v1, %v48_v0  ;;  %v51_v4 = vld [vmem:[%s7855_s1 + $0x18] sm:$0xff]  ;;  %v52_v6 = vld [vmem:[%s7855_s1 + $0x20] sm:$0xff]  ;;  %v53_v7 = vld [vmem:[%s7855_s1 + $0x28] sm:$0xff] }
   0x3   :  { %v6259_v5 = vpack.c.bf16 %v51_v4, %v50_v2  ;;  %v32_v8 = vld [vmem:[%s7856_s0] sm:$0xff]  ;;  %v6263_v9 = vpack.c.bf16 %v53_v7, %v52_v6  ;;  %v54_v10 = vld [vmem:[%s7855_s1 + $0x30] sm:$0xff]  ;;  %v55_v11 = vld [vmem:[%s7855_s1 + $0x38] sm:$0xff] }
   0x4   :  { %6256 = vmatprep.subr.bf16.mxu0 %v6255_v3  ;;  %5383 = vmatprep.mubr.msk.f32.mxu0 %vm63_vm0, %v32_v8  ;;  %v6267_v12 = vpack.c.bf16 %v55_v11, %v54_v10  ;;  %v33_v13 = vld [vmem:[%s7856_s0 + $0x8] sm:$0xff]  ;;  %v34_v14 = vld [vmem:[%s7856_s0 + $0x10] sm:$0xff]  ;;  %v35_v15 = vld [vmem:[%s7856_s0 + $0x18] sm:$0xff] }
   0x5   :  { %6258 = vmatpush3.bf16.msra.mxu0 %v6255_v3  ;;  %v36_v16 = vld [vmem:[%s7856_s0 + $0x20] sm:$0xff]  ;;  %v37_v17 = vld [vmem:[%s7856_s0 + $0x28] sm:$0xff]  ;;  %v38_v18 = vld [vmem:[%s7856_s0 + $0x30] sm:$0xff] }
   0x6   :  { %6260 = vmatprep.subr.bf16.mxu0 %v6259_v5  ;;  %v39_v19 = vld [vmem:[%s7856_s0 + $0x38] sm:$0xff]  ;;  %v40_v20 = vld [vmem:[%s7856_s0 + $0x40] sm:$0xff]  ;;  %v41_v21 = vld [vmem:[%s7856_s0 + $0x48] sm:$0xff] }
   0x7   :  { %v42_v22 = vld [vmem:[%s7856_s0 + $0x50] sm:$0xff]  ;;  %v43_v23 = vld [vmem:[%s7856_s0 + $0x58] sm:$0xff]  ;;  %v44_v24 = vld [vmem:[%s7856_s0 + $0x60] sm:$0xff] }
   0x8   :  { %v45_v25 = vld [vmem:[%s7856_s0 + $0x68] sm:$0xff]  ;;  %v46_v26 = vld [vmem:[%s7856_s0 + $0x70] sm:$0xff]  ;;  %v47_v27 = vld [vmem:[%s7856_s0 + $0x78] sm:$0xff] }
   0x9   :  { %6262 = vmatpush3.bf16.msra.mxu0 %v6259_v5  ;;  %v4707_v28 = vld [vmem:[%s7857_s3 + $0x20] sm:$0xff] }
   0xa   :  { %6264 = vmatprep.subr.bf16.mxu0 %v6263_v9  ;;  %v289_v29 = vld [vmem:[%s7857_s3] sm:$0xff] }
   0xb   :  { %5439 = vmatprep.mubr.f32.mxu1 %v289_v29  ;;  %v7050_v30 = vld [vmem:[%s7858_s2] ss:$0 sm:$0xff] }
   0xd   :  { %6266 = vmatpush3.bf16.msra.mxu0 %v6263_v9 }
   0xe   :  { %6268 = vmatprep.subr.bf16.mxu0 %v6267_v12 }
  0x11   :  { %6270 = vmatpush3.bf16.msra.mxu0 %v6267_v12 }
  0x14   :  { %5384 = vmatmul.mubr.msk.f32.vlgmr.msra.gmra.mrb[0].mxu0 %vm63_vm0, %v33_v13 }
  0x15   :  { %5386 = vmatprep.mubr.msk.f32.mxu0 %vm63_vm0, %v34_v14 }
  0x18   :  { %5387 = vmatmul.mubr.msk.f32.gmra.mrb[2].mxu0 %vm63_vm0, %v35_v15 }
  0x19   :  { %5389 = vmatprep.mubr.msk.f32.mxu0 %vm63_vm0, %v36_v16 }
  0x1c   :  { %5390 = vmatmul.mubr.msk.f32.gmra.mrb[4].mxu0 %vm63_vm0, %v37_v17 }
  0x1d   :  { %5392 = vmatprep.mubr.msk.f32.mxu0 %vm63_vm0, %v38_v18 }
  0x20   :  { %5393 = vmatmul.mubr.msk.f32.gmra.mrb[6].mxu0 %vm63_vm0, %v39_v19 }
  0x21   :  { %5395 = vmatprep.mubr.msk.f32.mxu0 %vm63_vm0, %v40_v20 }
  0x24   :  { %5396 = vmatmul.mubr.msk.f32.gmra.mrb[8].mxu0 %vm63_vm0, %v41_v21 }
  0x25   :  { %5398 = vmatprep.mubr.msk.f32.mxu0 %vm63_vm0, %v42_v22 }
  0x28   :  { %5399 = vmatmul.mubr.msk.f32.gmra.mrb[10].mxu0 %vm63_vm0, %v43_v23 }
  0x29   :  { %5401 = vmatprep.mubr.msk.f32.mxu0 %vm63_vm0, %v44_v24 }
  0x2c   :  { %5402 = vmatmul.mubr.msk.f32.gmra.mrb[12].mxu0 %vm63_vm0, %v45_v25 }
  0x2d   :  { %5404 = vmatprep.mubr.msk.f32.mxu0 %vm63_vm0, %v46_v26 }
  0x30   :  { %5405 = vmatmul.mubr.msk.f32.gmra.mrb[14].mxu0 %vm63_vm0, %v47_v27 }
  0x31   :  { %5477 = vmatprep.mubr.f32.mxu0 %v4707_v28 }
  0xe7   :  { %v5385_v31 = vpop.f32.mrb[0].mxu0 }
  0xe8   :  { %v184_v32 = vadd.f32 %v5385_v31, %v7050_v30  ;;  %v178_v33 = vpop.f32.mrb[1].mxu0 }
  0xe9   :  { %v179_v34 = vadd.f32 %v7050_v30, %v178_v33 }
  0xea   :  { %v258_v35 = vmul.f32 0.2, %v184_v32 }
  0xeb   :  { %v257_v36 = vmul.f32 0.2, %v179_v34  ;;  %v5388_v37 = vpop.f32.mrb[2].mxu0 }
  0xec   :  { %v274_v38 = vmax.f32 %v184_v32, %v258_v35  ;;  %v194_v39 = vadd.f32 %v5388_v37, %v7050_v30  ;;  %v188_v40 = vpop.f32.mrb[3].mxu0 }
  0xed   :  { %v273_v41 = vmax.f32 %v179_v34, %v257_v36  ;;  %v189_v42 = vadd.f32 %v7050_v30, %v188_v40  ;;  %v290_v40 = vld [vmem:[%s7857_s3 + $0x8] sm:$0xff] }
  0xee   :  { %v260_v43 = vmul.f32 0.2, %v194_v39 }
  0xef   :  { %v7056_v44 = vpack.c.bf16 %v274_v38, %v273_v41  ;;  %v259_v45 = vmul.f32 0.2, %v189_v42  ;;  %v5391_v46 = vpop.f32.mrb[4].mxu0  ;;  %v4709_v41 = vld [vmem:[%s7857_s3 + $0x30] sm:$0xff] }
  0xf0   :  { %v276_v47 = vmax.f32 %v194_v39, %v260_v43  ;;  %v204_v48 = vadd.f32 %v5391_v46, %v7050_v30  ;;  %v198_v49 = vpop.f32.mrb[5].mxu0  ;;  %v4708_v39 = vld [vmem:[%s7857_s3 + $0x28] sm:$0xff]  ;;  %v4710_v43 = vld [vmem:[%s7857_s3 + $0x38] sm:$0xff]  ;;  %v4720_v46 = vld [vmem:[%s7857_s3 + $0x40] sm:$0xff] }
  0xf1   :  { %v275_v50 = vmax.f32 %v189_v42, %v259_v45  ;;  %v199_v51 = vadd.f32 %v7050_v30, %v198_v49  ;;  %6272 = vmatprep.subr.bf16.mxu1 %v7056_v44  ;;  %6304 = vmatprep.subr.bf16.mxu0 %v7056_v44  ;;  %v291_v42 = vld [vmem:[%s7857_s3 + $0x10] sm:$0xff]  ;;  %v292_v45 = vld [vmem:[%s7857_s3 + $0x18] sm:$0xff] }
  0xf2   :  { %v262_v52 = vmul.f32 0.2, %v204_v48  ;;  %6274 = vmatpush3.bf16.msra.mxu1 %v7056_v44  ;;  %6306 = vmatpush3.bf16.msra.mxu0 %v7056_v44  ;;  %v4723_v49 = vld [vmem:[%s7857_s3 + $0x58] sm:$0xff] }
  0xf3   :  { %v7064_v53 = vpack.c.bf16 %v276_v47, %v275_v50  ;;  %v261_v54 = vmul.f32 0.2, %v199_v51  ;;  %v5394_v55 = vpop.f32.mrb[6].mxu0  ;;  %v4721_v47 = vld [vmem:[%s7857_s3 + $0x48] sm:$0xff]  ;;  %v4738_v50 = vld [vmem:[%s7857_s3 + $0x80] sm:$0xff] }
  0xf4   :  { %v278_v56 = vmax.f32 %v204_v48, %v262_v52  ;;  %v214_v57 = vadd.f32 %v5394_v55, %v7050_v30  ;;  %v208_v58 = vpop.f32.mrb[7].mxu0  ;;  %v4722_v48 = vld [vmem:[%s7857_s3 + $0x50] sm:$0xff]  ;;  %v4756_v55 = vld [vmem:[%s7857_s3 + $0xc0] sm:$0xff] }
  0xf5   :  { %v277_v59 = vmax.f32 %v199_v51, %v261_v54  ;;  %v209_v60 = vadd.f32 %v7050_v30, %v208_v58  ;;  %6276 = vmatprep.subr.bf16.mxu1 %v7064_v53  ;;  %6308 = vmatprep.subr.bf16.mxu0 %v7064_v53  ;;  %v4739_v51 = vld [vmem:[%s7857_s3 + $0x88] sm:$0xff]  ;;  %v4740_v52 = vld [vmem:[%s7857_s3 + $0x90] sm:$0xff]  ;;  %v4741_v54 = vld [vmem:[%s7857_s3 + $0x98] sm:$0xff] }
  0xf6   :  { %v264_v61 = vmul.f32 0.2, %v214_v57  ;;  %6278 = vmatpush3.bf16.msra.mxu1 %v7064_v53  ;;  %6310 = vmatpush3.bf16.msra.mxu0 %v7064_v53  ;;  %v4757_v58 = vld [vmem:[%s7857_s3 + $0xc8] sm:$0xff] }
  0xf7   :  { %v7072_v62 = vpack.c.bf16 %v278_v56, %v277_v59  ;;  %v263_v63 = vmul.f32 0.2, %v209_v60  ;;  %v5397_v0 = vpop.f32.mrb[8].mxu0  ;;  %v4711_v56 = vld [vmem:[%s7859_s4 + $0x8] sm:$0xff]  ;;  %v4758_v59 = vld [vmem:[%s7857_s3 + $0xd0] sm:$0xff] }
  0xf8   :  { %v280_v1 = vmax.f32 %v214_v57, %v264_v61  ;;  %v224_v2 = vadd.f32 %v5397_v0, %v7050_v30  ;;  %v218_v3 = vpop.f32.mrb[9].mxu0  ;;  %v7214_v57 = vld [vmem:[%s7859_s4] sm:$0xff]  ;;  %v4767_v0 = vld [vmem:[%s7857_s3 + $0xf0] sm:$0xff] }
  0xf9   :  { %v279_v4 = vmax.f32 %v209_v60, %v263_v63  ;;  %v219_v5 = vadd.f32 %v7050_v30, %v218_v3  ;;  %6280 = vmatprep.subr.bf16.mxu1 %v7072_v62  ;;  %6312 = vmatprep.subr.bf16.mxu0 %v7072_v62  ;;  %v4759_v60 = vld [vmem:[%s7857_s3 + $0xd8] sm:$0xff]  ;;  %v4765_v61 = vld [vmem:[%s7857_s3 + $0xe0] sm:$0xff]  ;;  %v4766_v63 = vld [vmem:[%s7857_s3 + $0xe8] sm:$0xff] }
  0xfa   :  { %v266_v6 = vmul.f32 0.2, %v224_v2  ;;  %6282 = vmatpush3.bf16.msra.mxu1 %v7072_v62  ;;  %6314 = vmatpush3.bf16.msra.mxu0 %v7072_v62  ;;  %v4784_v3 = vld [vmem:[%s7857_s3 + $0x128] sm:$0xff] }
  0xfb   :  { %v7080_v7 = vpack.c.bf16 %v280_v1, %v279_v4  ;;  %v265_v8 = vmul.f32 0.2, %v219_v5  ;;  %v5400_v9 = vpop.f32.mrb[10].mxu0  ;;  %v4768_v1 = vld [vmem:[%s7857_s3 + $0xf8] sm:$0xff]  ;;  %v4785_v4 = vld [vmem:[%s7857_s3 + $0x130] sm:$0xff] }
  0xfc   :  { %v282_v10 = vmax.f32 %v224_v2, %v266_v6  ;;  %v234_v11 = vadd.f32 %v5400_v9, %v7050_v30  ;;  %v228_v12 = vpop.f32.mrb[11].mxu0  ;;  %v4783_v2 = vld [vmem:[%s7857_s3 + $0x120] sm:$0xff]  ;;  %v4794_v9 = vld [vmem:[%s7857_s3 + $0x150] sm:$0xff] }
  0xfd   :  { %v281_v13 = vmax.f32 %v219_v5, %v265_v8  ;;  %v229_v14 = vadd.f32 %v7050_v30, %v228_v12  ;;  %6284 = vmatprep.subr.bf16.mxu1 %v7080_v7  ;;  %6316 = vmatprep.subr.bf16.mxu0 %v7080_v7  ;;  %v4786_v5 = vld [vmem:[%s7857_s3 + $0x138] sm:$0xff]  ;;  %v4792_v6 = vld [vmem:[%s7857_s3 + $0x140] sm:$0xff]  ;;  %v4793_v8 = vld [vmem:[%s7857_s3 + $0x148] sm:$0xff] }
  0xfe   :  { %v268_v15 = vmul.f32 0.2, %v234_v11  ;;  %6286 = vmatpush3.bf16.msra.mxu1 %v7080_v7  ;;  %6318 = vmatpush3.bf16.msra.mxu0 %v7080_v7 }
  0xff   :  { %v7088_v16 = vpack.c.bf16 %v282_v10, %v281_v13  ;;  %v267_v17 = vmul.f32 0.2, %v229_v14  ;;  %v5403_v18 = vpop.f32.mrb[12].mxu0  ;;  %v4795_v10 = vld [vmem:[%s7857_s3 + $0x158] sm:$0xff] }
 0x100   :  { %v284_v19 = vmax.f32 %v234_v11, %v268_v15  ;;  %v244_v20 = vadd.f32 %v5403_v18, %v7050_v30  ;;  %v238_v21 = vpop.f32.mrb[13].mxu0  ;;  %v4810_v11 = vld [vmem:[%s7857_s3 + $0x180] sm:$0xff] }
 0x101   :  { %v283_v22 = vmax.f32 %v229_v14, %v267_v17  ;;  %v239_v23 = vadd.f32 %v7050_v30, %v238_v21  ;;  %6288 = vmatprep.subr.bf16.mxu1 %v7088_v16  ;;  %6320 = vmatprep.subr.bf16.mxu0 %v7088_v16  ;;  %v4724_v17 = vld [vmem:[%s7859_s4 + $0x10] sm:$0xff] }
 0x102   :  { %v270_v24 = vmul.f32 0.2, %v244_v20  ;;  %6290 = vmatpush3.bf16.msra.mxu1 %v7088_v16  ;;  %6322 = vmatpush3.bf16.msra.mxu0 %v7088_v16 }
 0x103   :  { %v7096_v25 = vpack.c.bf16 %v284_v19, %v283_v22  ;;  %v269_v26 = vmul.f32 0.2, %v239_v23  ;;  %v5406_v27 = vpop.f32.mrb[14].mxu0  ;;  %v4811_v22 = vld [vmem:[%s7857_s3 + $0x188] sm:$0xff] }
 0x104   :  { %v286_v28 = vmax.f32 %v244_v20, %v270_v24  ;;  %v254_v29 = vadd.f32 %v5406_v27, %v7050_v30  ;;  %v248_v31 = vpop.f32.mrb[15].mxu0  ;;  %v4813_v24 = vld [vmem:[%s7857_s3 + $0x198] sm:$0xff] }
 0x105   :  { %v285_v32 = vmax.f32 %v239_v23, %v269_v26  ;;  %v249_v33 = vadd.f32 %v7050_v30, %v248_v31  ;;  %6292 = vmatprep.subr.bf16.mxu1 %v7096_v25  ;;  %6324 = vmatprep.subr.bf16.mxu0 %v7096_v25  ;;  %v4812_v23 = vld [vmem:[%s7857_s3 + $0x190] sm:$0xff]  ;;  %v4828_v26 = vld [vmem:[%s7857_s3 + $0x1c0] sm:$0xff] }
 0x106   :  { %v272_v34 = vmul.f32 0.2, %v254_v29  ;;  %6294 = vmatpush3.bf16.msra.mxu1 %v7096_v25  ;;  %6326 = vmatpush3.bf16.msra.mxu0 %v7096_v25 }
 0x107   :  { %v7104_v35 = vpack.c.bf16 %v286_v28, %v285_v32  ;;  %v271_v36 = vmul.f32 0.2, %v249_v33  ;;  %v4729_v32 = vld [vmem:[%s7857_s3 + $0x60] sm:$0xff] }
 0x108   :  { %v288_v37 = vmax.f32 %v254_v29, %v272_v34  ;;  %v4733_v34 = vld [vmem:[%s7859_s4 + $0x18] sm:$0xff] }
 0x109   :  { %v287_v38 = vmax.f32 %v249_v33, %v271_v36  ;;  %6296 = vmatprep.subr.bf16.mxu1 %v7104_v35  ;;  %6328 = vmatprep.subr.bf16.mxu0 %v7104_v35  ;;  %v4829_v33 = vld [vmem:[%s7857_s3 + $0x1c8] sm:$0xff] }
 0x10a   :  { %6298 = vmatpush3.bf16.msra.mxu1 %v7104_v35  ;;  %6330 = vmatpush3.bf16.msra.mxu0 %v7104_v35  ;;  %v4730_v36 = vld [vmem:[%s7857_s3 + $0x68] sm:$0xff] }
 0x10b   :  { %v7110_v30 = vpack.c.bf16 %v288_v37, %v287_v38  ;;  %v4731_v37 = vld [vmem:[%s7857_s3 + $0x70] sm:$0xff]  ;;  %v4732_v38 = vld [vmem:[%s7857_s3 + $0x78] sm:$0xff] }
 0x10d   :  { %6300 = vmatprep.subr.bf16.mxu1 %v7110_v30  ;;  %6332 = vmatprep.subr.bf16.mxu0 %v7110_v30 }
 0x10e   :  { %6302 = vmatpush3.bf16.msra.mxu1 %v7110_v30  ;;  %6334 = vmatpush3.bf16.msra.mxu0 %v7110_v30 }
 0x10f   :  { %6336 = vmatprep.subr.bf16.mxu0 %v7056_v44  ;;  %5483 = vmatprep.subr.mxu1 %v4711_v56 }
 0x111   :  { %5478 = vmatmul.mubr.f32.vlgmr.msra.gmra.mrb[16].mxu0 %v4708_v39  ;;  %5440 = vmatmul.mubr.f32.vlgmr.msra.gmra.mrb[0].mxu1 %v290_v40  ;;  %v4742_v39 = vld [vmem:[%s7859_s4 + $0x20] sm:$0xff] }
 0x112   :  { %6338 = vmatpush3.bf16.msra.mxu0 %v7056_v44  ;;  %5480 = vmatprep.mubr.f32.mxu0 %v4709_v41 }
 0x113   :  { %6340 = vmatprep.subr.bf16.mxu0 %v7064_v53  ;;  %5442 = vmatprep.mubr.f32.mxu1 %v291_v42 }
 0x114   :  { %5484 = vmatpush3.msra.mxu1 %v4711_v56  ;;  %v4750_v56 = vld [vmem:[%s7857_s3 + $0xb8] sm:$0xff] }
 0x115   :  { %5481 = vmatmul.mubr.f32.gmra.mrb[18].mxu0 %v4710_v43  ;;  %5443 = vmatmul.mubr.f32.gmra.mrb[2].mxu1 %v292_v45 }
 0x116   :  { %6342 = vmatpush3.bf16.msra.mxu0 %v7064_v53  ;;  %5531 = vmatprep.mubr.f32.mxu0 %v4720_v46 }
 0x117   :  { %6344 = vmatprep.subr.bf16.mxu0 %v7072_v62  ;;  %5491 = vmatprep.subr.mxu1 %v7214_v57 }
 0x11a   :  { %6346 = vmatpush3.bf16.msra.mxu0 %v7072_v62 }
 0x11b   :  { %6348 = vmatprep.subr.bf16.mxu0 %v7080_v7 }
 0x11e   :  { %6350 = vmatpush3.bf16.msra.mxu0 %v7080_v7 }
 0x11f   :  { %6352 = vmatprep.subr.bf16.mxu0 %v7088_v16 }
 0x122   :  { %6354 = vmatpush3.bf16.msra.mxu0 %v7088_v16 }
 0x123   :  { %6356 = vmatprep.subr.bf16.mxu0 %v7096_v25 }
 0x126   :  { %6358 = vmatpush3.bf16.msra.mxu0 %v7096_v25 }
 0x127   :  { %6360 = vmatprep.subr.bf16.mxu0 %v7104_v35 }
 0x12a   :  { %6362 = vmatpush3.bf16.msra.mxu0 %v7104_v35 }
 0x12b   :  { %6364 = vmatprep.subr.bf16.mxu0 %v7110_v30 }
 0x12e   :  { %6366 = vmatpush3.bf16.msra.mxu0 %v7110_v30 }
 0x12f   :  { %6400 = vmatprep.subr.bf16.mxu0 %v7056_v44 }
 0x131   :  { %5532 = vmatmul.mubr.f32.vlgmr.msra.gmra.mrb[20].mxu0 %v4721_v47 }
 0x132   :  { %6402 = vmatpush3.bf16.msra.mxu0 %v7056_v44  ;;  %5534 = vmatprep.mubr.f32.mxu0 %v4722_v48 }
 0x133   :  { %6404 = vmatprep.subr.bf16.mxu0 %v7064_v53 }
 0x135   :  { %5535 = vmatmul.mubr.f32.gmra.mrb[22].mxu0 %v4723_v49 }
 0x136   :  { %6406 = vmatpush3.bf16.msra.mxu0 %v7064_v53  ;;  %5623 = vmatprep.mubr.f32.mxu0 %v4738_v50 }
 0x137   :  { %6408 = vmatprep.subr.bf16.mxu0 %v7072_v62 }
 0x13a   :  { %6410 = vmatpush3.bf16.msra.mxu0 %v7072_v62 }
 0x13b   :  { %6412 = vmatprep.subr.bf16.mxu0 %v7080_v7 }
 0x13e   :  { %6414 = vmatpush3.bf16.msra.mxu0 %v7080_v7 }
 0x13f   :  { %6416 = vmatprep.subr.bf16.mxu0 %v7088_v16 }
 0x142   :  { %6418 = vmatpush3.bf16.msra.mxu0 %v7088_v16 }
 0x143   :  { %6420 = vmatprep.subr.bf16.mxu0 %v7096_v25 }
 0x146   :  { %6422 = vmatpush3.bf16.msra.mxu0 %v7096_v25 }
 0x147   :  { %6424 = vmatprep.subr.bf16.mxu0 %v7104_v35 }
 0x14a   :  { %6426 = vmatpush3.bf16.msra.mxu0 %v7104_v35 }
 0x14b   :  { %6428 = vmatprep.subr.bf16.mxu0 %v7110_v30 }
 0x14e   :  { %6430 = vmatpush3.bf16.msra.mxu0 %v7110_v30 }
 0x14f   :  { %6464 = vmatprep.subr.bf16.mxu0 %v7056_v44 }
 0x151   :  { %5624 = vmatmul.mubr.f32.vlgmr.msra.gmra.mrb[24].mxu0 %v4739_v51  ;;  %v4747_v51 = vld [vmem:[%s7857_s3 + $0xa0] sm:$0xff] }
 0x152   :  { %6466 = vmatpush3.bf16.msra.mxu0 %v7056_v44  ;;  %5626 = vmatprep.mubr.f32.mxu0 %v4740_v52  ;;  %v4751_v52 = vld [vmem:[%s7859_s4 + $0x28] sm:$0xff] }
 0x153   :  { %6468 = vmatprep.subr.bf16.mxu0 %v7064_v53 }
 0x155   :  { %5627 = vmatmul.mubr.f32.gmra.mrb[26].mxu0 %v4741_v54  ;;  %v4748_v54 = vld [vmem:[%s7857_s3 + $0xa8] sm:$0xff] }
 0x156   :  { %6470 = vmatpush3.bf16.msra.mxu0 %v7064_v53  ;;  %5715 = vmatprep.mubr.f32.mxu0 %v4756_v55  ;;  %v4749_v55 = vld [vmem:[%s7857_s3 + $0xb0] sm:$0xff] }
 0x157   :  { %6472 = vmatprep.subr.bf16.mxu0 %v7072_v62 }
 0x15a   :  { %6474 = vmatpush3.bf16.msra.mxu0 %v7072_v62 }
 0x15b   :  { %6476 = vmatprep.subr.bf16.mxu0 %v7080_v7 }
 0x15e   :  { %6478 = vmatpush3.bf16.msra.mxu0 %v7080_v7 }
 0x15f   :  { %6480 = vmatprep.subr.bf16.mxu0 %v7088_v16 }
 0x162   :  { %6482 = vmatpush3.bf16.msra.mxu0 %v7088_v16 }
 0x163   :  { %6484 = vmatprep.subr.bf16.mxu0 %v7096_v25 }
 0x166   :  { %6486 = vmatpush3.bf16.msra.mxu0 %v7096_v25 }
 0x167   :  { %6488 = vmatprep.subr.bf16.mxu0 %v7104_v35 }
 0x16a   :  { %6490 = vmatpush3.bf16.msra.mxu0 %v7104_v35 }
 0x16b   :  { %6492 = vmatprep.subr.bf16.mxu0 %v7110_v30 }
 0x16e   :  { %6494 = vmatpush3.bf16.msra.mxu0 %v7110_v30 }
 0x16f   :  { %6496 = vmatprep.subr.bf16.mxu0 %v7056_v44 }
 0x171   :  { %5716 = vmatmul.mubr.f32.vlgmr.msra.gmra.mrb[28].mxu0 %v4757_v58 }
 0x172   :  { %6498 = vmatpush3.bf16.msra.mxu0 %v7056_v44  ;;  %5718 = vmatprep.mubr.f32.mxu0 %v4758_v59 }
 0x173   :  { %6500 = vmatprep.subr.bf16.mxu0 %v7064_v53 }
 0x175   :  { %5719 = vmatmul.mubr.f32.gmra.mrb[30].mxu0 %v4759_v60 }
 0x176   :  { %6502 = vmatpush3.bf16.msra.mxu0 %v7064_v53  ;;  %5761 = vmatprep.mubr.f32.mxu0 %v4765_v61 }
 0x177   :  { %6504 = vmatprep.subr.bf16.mxu0 %v7072_v62 }
 0x17a   :  { %6506 = vmatpush3.bf16.msra.mxu0 %v7072_v62 }
 0x17b   :  { %6508 = vmatprep.subr.bf16.mxu0 %v7080_v7 }
 0x17e   :  { %6510 = vmatpush3.bf16.msra.mxu0 %v7080_v7 }
 0x17f   :  { %6512 = vmatprep.subr.bf16.mxu0 %v7088_v16 }
 0x182   :  { %6514 = vmatpush3.bf16.msra.mxu0 %v7088_v16 }
 0x183   :  { %6516 = vmatprep.subr.bf16.mxu0 %v7096_v25 }
 0x186   :  { %6518 = vmatpush3.bf16.msra.mxu0 %v7096_v25 }
 0x187   :  { %6520 = vmatprep.subr.bf16.mxu0 %v7104_v35 }
 0x18a   :  { %6522 = vmatpush3.bf16.msra.mxu0 %v7104_v35 }
 0x18b   :  { %6524 = vmatprep.subr.bf16.mxu0 %v7110_v30 }
 0x18e   :  { %6526 = vmatpush3.bf16.msra.mxu0 %v7110_v30 }
 0x18f   :  { %6560 = vmatprep.subr.bf16.mxu0 %v7056_v44 }
 0x191   :  { %5762 = vmatmul.mubr.f32.vlgmr.msra.gmra.mrb[32].mxu0 %v4766_v63 }
 0x192   :  { %6562 = vmatpush3.bf16.msra.mxu0 %v7056_v44  ;;  %5764 = vmatprep.mubr.f32.mxu0 %v4767_v0 }
 0x193   :  { %6564 = vmatprep.subr.bf16.mxu0 %v7064_v53 }
 0x195   :  { %5765 = vmatmul.mubr.f32.gmra.mrb[34].mxu0 %v4768_v1 }
 0x196   :  { %6566 = vmatpush3.bf16.msra.mxu0 %v7064_v53  ;;  %5853 = vmatprep.mubr.f32.mxu0 %v4783_v2 }
 0x197   :  { %6568 = vmatprep.subr.bf16.mxu0 %v7072_v62 }
 0x19a   :  { %6570 = vmatpush3.bf16.msra.mxu0 %v7072_v62 }
 0x19b   :  { %6572 = vmatprep.subr.bf16.mxu0 %v7080_v7 }
 0x19e   :  { %6574 = vmatpush3.bf16.msra.mxu0 %v7080_v7 }
 0x19f   :  { %6576 = vmatprep.subr.bf16.mxu0 %v7088_v16 }
 0x1a2   :  { %6578 = vmatpush3.bf16.msra.mxu0 %v7088_v16 }
 0x1a3   :  { %6580 = vmatprep.subr.bf16.mxu0 %v7096_v25 }
 0x1a6   :  { %6582 = vmatpush3.bf16.msra.mxu0 %v7096_v25 }
 0x1a7   :  { %6584 = vmatprep.subr.bf16.mxu0 %v7104_v35 }
 0x1aa   :  { %6586 = vmatpush3.bf16.msra.mxu0 %v7104_v35 }
 0x1ab   :  { %6588 = vmatprep.subr.bf16.mxu0 %v7110_v30 }
 0x1ae   :  { %6590 = vmatpush3.bf16.msra.mxu0 %v7110_v30 }
 0x1af   :  { %6592 = vmatprep.subr.bf16.mxu0 %v7056_v44 }
 0x1b1   :  { %5854 = vmatmul.mubr.f32.vlgmr.msra.gmra.mrb[36].mxu0 %v4784_v3 }
 0x1b2   :  { %6594 = vmatpush3.bf16.msra.mxu0 %v7056_v44  ;;  %5856 = vmatprep.mubr.f32.mxu0 %v4785_v4 }
 0x1b3   :  { %6596 = vmatprep.subr.bf16.mxu0 %v7064_v53 }
 0x1b5   :  { %5857 = vmatmul.mubr.f32.gmra.mrb[38].mxu0 %v4786_v5  ;;  %v4769_v5 = vld [vmem:[%s7859_s4 + $0x38] sm:$0xff] }
 0x1b6   :  { %6598 = vmatpush3.bf16.msra.mxu0 %v7064_v53  ;;  %5899 = vmatprep.mubr.f32.mxu0 %v4792_v6 }
 0x1b7   :  { %6600 = vmatprep.subr.bf16.mxu0 %v7072_v62 }
 0x1ba   :  { %6602 = vmatpush3.bf16.msra.mxu0 %v7072_v62 }
 0x1bb   :  { %6604 = vmatprep.subr.bf16.mxu0 %v7080_v7 }
 0x1be   :  { %6606 = vmatpush3.bf16.msra.mxu0 %v7080_v7 }
 0x1bf   :  { %6608 = vmatprep.subr.bf16.mxu0 %v7088_v16 }
 0x1c2   :  { %6610 = vmatpush3.bf16.msra.mxu0 %v7088_v16 }
 0x1c3   :  { %6612 = vmatprep.subr.bf16.mxu0 %v7096_v25 }
 0x1c6   :  { %6614 = vmatpush3.bf16.msra.mxu0 %v7096_v25 }
 0x1c7   :  { %6616 = vmatprep.subr.bf16.mxu0 %v7104_v35 }
 0x1ca   :  { %6618 = vmatpush3.bf16.msra.mxu0 %v7104_v35 }
 0x1cb   :  { %6620 = vmatprep.subr.bf16.mxu0 %v7110_v30 }
 0x1ce   :  { %6622 = vmatpush3.bf16.msra.mxu0 %v7110_v30 }
 0x1cf   :  { %6656 = vmatprep.subr.bf16.mxu0 %v7056_v44 }
 0x1d1   :  { %5900 = vmatmul.mubr.f32.vlgmr.msra.gmra.mrb[40].mxu0 %v4793_v8 }
 0x1d2   :  { %6658 = vmatpush3.bf16.msra.mxu0 %v7056_v44  ;;  %5902 = vmatprep.mubr.f32.mxu0 %v4794_v9  ;;  %v4774_v9 = vld [vmem:[%s7857_s3 + $0x100] sm:$0xff] }
 0x1d3   :  { %6660 = vmatprep.subr.bf16.mxu0 %v7064_v53 }
 0x1d5   :  { %5903 = vmatmul.mubr.f32.gmra.mrb[42].mxu0 %v4795_v10  ;;  %v4778_v10 = vld [vmem:[%s7859_s4 + $0x40] sm:$0xff] }
 0x1d6   :  { %6662 = vmatpush3.bf16.msra.mxu0 %v7064_v53  ;;  %5991 = vmatprep.mubr.f32.mxu0 %v4810_v11  ;;  %v4775_v11 = vld [vmem:[%s7857_s3 + $0x108] sm:$0xff] }
 0x1d7   :  { %6664 = vmatprep.subr.bf16.mxu0 %v7072_v62 }
 0x1da   :  { %6666 = vmatpush3.bf16.msra.mxu0 %v7072_v62 }
 0x1db   :  { %6668 = vmatprep.subr.bf16.mxu0 %v7080_v7 }
 0x1de   :  { %6670 = vmatpush3.bf16.msra.mxu0 %v7080_v7 }
 0x1df   :  { %6672 = vmatprep.subr.bf16.mxu0 %v7088_v16 }
 0x1e2   :  { %6674 = vmatpush3.bf16.msra.mxu0 %v7088_v16 }
 0x1e3   :  { %6676 = vmatprep.subr.bf16.mxu0 %v7096_v25 }
 0x1e4   :  { %v5479_v12 = vpop.f32.mrb[16].mxu0  ;;  %v5441_v13 = vpop.f32.mrb[0].mxu1 }
 0x1e5   :  { %v450_v14 = vpop.f32.mrb[17].mxu0  ;;  %v359_v15 = vpop.f32.mrb[1].mxu1 }
 0x1e6   :  { %5485 = vmatprep.mubr.msk.f32.mxu1 %vm471_vm1, %v450_v14  ;;  %6678 = vmatpush3.bf16.msra.mxu0 %v7096_v25  ;;  %v4787_v14 = vld [vmem:[%s7859_s4 + $0x48] sm:$0xff] }
 0x1e7   :  { %5486 = vmatmul.mubr.msk.f32.vlgmr.msra.gmra.mrb[4].mxu1 %vm471_vm1, %v5479_v12  ;;  %6680 = vmatprep.subr.bf16.mxu0 %v7104_v35  ;;  %v4776_v12 = vld [vmem:[%s7857_s3 + $0x110] sm:$0xff] }
 0x1e8   :  { %v5482_v18 = vpop.f32.mrb[18].mxu0  ;;  %5492 = vmatpush3.msra.mxu1 %v7214_v57  ;;  %v5444_v19 = vpop.f32.mrb[2].mxu1  ;;  %v4760_v57 = vld [vmem:[%s7859_s4 + $0x30] sm:$0xff] }
 0x1e9   :  { %v460_v20 = vpop.f32.mrb[19].mxu0  ;;  %5537 = vmatprep.subr.mxu1 %v4724_v17  ;;  %v369_v21 = vpop.f32.mrb[3].mxu1 }
 0x1ea   :  { %5488 = vmatprep.mubr.msk.f32.mxu1 %vm471_vm1, %v460_v20  ;;  %6682 = vmatpush3.bf16.msra.mxu0 %v7104_v35 }
 0x1eb   :  { %5489 = vmatmul.mubr.msk.f32.gmra.mrb[6].mxu1 %vm471_vm1, %v5482_v18  ;;  %6684 = vmatprep.subr.bf16.mxu0 %v7110_v30 }
 0x1ec   :  { %5493 = vmatprep.mubr.msk.f32.mxu1 %vm471_vm1, %v359_v15 }
 0x1ee   :  { %6686 = vmatpush3.bf16.msra.mxu0 %v7110_v30 }
 0x1ef   :  { %5494 = vmatmul.mubr.msk.f32.vlgmr.msra.gmra.mrb[4].mxu1 %vm471_vm1, %v5441_v13  ;;  %6720 = vmatprep.subr.bf16.mxu0 %v7056_v44  ;;  %v4777_v13 = vld [vmem:[%s7857_s3 + $0x118] sm:$0xff] }
 0x1f0   :  { %5538 = vmatpush3.msra.mxu1 %v4724_v17  ;;  %5496 = vmatprep.mubr.msk.f32.mxu1 %vm471_vm1, %v369_v21 }
 0x1f1   :  { %6368 = vmatprep.subr.bf16.mxu1 %v7056_v44  ;;  %5992 = vmatmul.mubr.f32.vlgmr.msra.gmra.mrb[44].mxu0 %v4811_v22 }
 0x1f2   :  { %6722 = vmatpush3.bf16.msra.mxu0 %v7056_v44  ;;  %5994 = vmatprep.mubr.f32.mxu0 %v4812_v23 }
 0x1f3   :  { %6724 = vmatprep.subr.bf16.mxu0 %v7064_v53  ;;  %5497 = vmatmul.mubr.msk.f32.gmra.mrb[6].mxu1 %vm471_vm1, %v5444_v19 }
 0x1f5   :  { %5995 = vmatmul.mubr.f32.gmra.mrb[46].mxu0 %v4813_v24  ;;  %v4796_v24 = vld [vmem:[%s7859_s4 + $0x50] sm:$0xff] }
 0x1f6   :  { %6726 = vmatpush3.bf16.msra.mxu0 %v7064_v53  ;;  %6083 = vmatprep.mubr.f32.mxu0 %v4828_v26 }
 0x1f7   :  { %6728 = vmatprep.subr.bf16.mxu0 %v7072_v62 }
 0x1fa   :  { %6730 = vmatpush3.bf16.msra.mxu0 %v7072_v62 }
 0x1fb   :  { %6732 = vmatprep.subr.bf16.mxu0 %v7080_v7 }
 0x1fe   :  { %6734 = vmatpush3.bf16.msra.mxu0 %v7080_v7 }
 0x1ff   :  { %6736 = vmatprep.subr.bf16.mxu0 %v7088_v16 }
 0x202   :  { %6738 = vmatpush3.bf16.msra.mxu0 %v7088_v16 }
 0x203   :  { %6740 = vmatprep.subr.bf16.mxu0 %v7096_v25 }
 0x204   :  { %v5533_v27 = vpop.f32.mrb[20].mxu0 }
 0x205   :  { %v737_v28 = vpop.f32.mrb[21].mxu0 }
 0x206   :  { %5539 = vmatprep.mubr.msk.f32.mxu1 %vm471_vm1, %v737_v28  ;;  %6742 = vmatpush3.bf16.msra.mxu0 %v7096_v25  ;;  %v4801_v28 = vld [vmem:[%s7857_s3 + $0x160] sm:$0xff] }
 0x207   :  { %5540 = vmatmul.mubr.msk.f32.vlgmr.msra.gmra.mrb[4].mxu1 %vm471_vm1, %v5533_v27  ;;  %6744 = vmatprep.subr.bf16.mxu0 %v7104_v35 }
 0x208   :  { %6370 = vmatpush3.bf16.msra.mxu1 %v7056_v44  ;;  %v5536_v29 = vpop.f32.mrb[22].mxu0 }
 0x209   :  { %6372 = vmatprep.subr.bf16.mxu1 %v7064_v53  ;;  %v747_v31 = vpop.f32.mrb[23].mxu0 }
 0x20a   :  { %6746 = vmatpush3.bf16.msra.mxu0 %v7104_v35  ;;  %5542 = vmatprep.mubr.msk.f32.mxu1 %vm471_vm1, %v747_v31  ;;  %v4802_v31 = vld [vmem:[%s7857_s3 + $0x168] sm:$0xff] }
 0x20b   :  { %6748 = vmatprep.subr.bf16.mxu0 %v7110_v30  ;;  %5543 = vmatmul.mubr.msk.f32.gmra.mrb[6].mxu1 %vm471_vm1, %v5536_v29  ;;  %v4805_v29 = vld [vmem:[%s7859_s4 + $0x58] sm:$0xff] }
 0x20c   :  { %6374 = vmatpush3.bf16.msra.mxu1 %v7064_v53  ;;  %5577 = vmatprep.mubr.f32.mxu1 %v4729_v32  ;;  %v4803_v32 = vld [vmem:[%s7857_s3 + $0x170] sm:$0xff] }
 0x20d   :  { %6376 = vmatprep.subr.bf16.mxu1 %v7072_v62 }
 0x20e   :  { %6750 = vmatpush3.bf16.msra.mxu0 %v7110_v30 }
 0x20f   :  { %6752 = vmatprep.subr.bf16.mxu0 %v7056_v44 }
 0x210   :  { %6378 = vmatpush3.bf16.msra.mxu1 %v7072_v62 }
 0x211   :  { %6380 = vmatprep.subr.bf16.mxu1 %v7080_v7  ;;  %6084 = vmatmul.mubr.f32.vlgmr.msra.gmra.mrb[48].mxu0 %v4829_v33  ;;  %v4804_v33 = vld [vmem:[%s7857_s3 + $0x178] sm:$0xff] }
 0x212   :  { %6754 = vmatpush3.bf16.msra.mxu0 %v7056_v44 }
 0x213   :  { %6756 = vmatprep.subr.bf16.mxu0 %v7064_v53 }
 0x214   :  { %6382 = vmatpush3.bf16.msra.mxu1 %v7080_v7 }
 0x215   :  { %6384 = vmatprep.subr.bf16.mxu1 %v7088_v16 }
 0x216   :  { %6758 = vmatpush3.bf16.msra.mxu0 %v7064_v53 }
 0x217   :  { %6760 = vmatprep.subr.bf16.mxu0 %v7072_v62 }
 0x218   :  { %6386 = vmatpush3.bf16.msra.mxu1 %v7088_v16 }
 0x219   :  { %6388 = vmatprep.subr.bf16.mxu1 %v7096_v25 }
 0x21a   :  { %6762 = vmatpush3.bf16.msra.mxu0 %v7072_v62 }
 0x21b   :  { %6764 = vmatprep.subr.bf16.mxu0 %v7080_v7 }
 0x21c   :  { %6390 = vmatpush3.bf16.msra.mxu1 %v7096_v25 }
 0x21d   :  { %6392 = vmatprep.subr.bf16.mxu1 %v7104_v35 }
 0x21e   :  { %6766 = vmatpush3.bf16.msra.mxu0 %v7080_v7 }
 0x21f   :  { %6768 = vmatprep.subr.bf16.mxu0 %v7088_v16 }
 0x220   :  { %6394 = vmatpush3.bf16.msra.mxu1 %v7104_v35 }
 0x221   :  { %6396 = vmatprep.subr.bf16.mxu1 %v7110_v30 }
 0x222   :  { %6770 = vmatpush3.bf16.msra.mxu0 %v7088_v16 }
 0x223   :  { %6772 = vmatprep.subr.bf16.mxu0 %v7096_v25 }
 0x224   :  { %6398 = vmatpush3.bf16.msra.mxu1 %v7110_v30  ;;  %v5625_v40 = vpop.f32.mrb[24].mxu0 }
 0x225   :  { %5583 = vmatprep.subr.mxu1 %v4733_v34  ;;  %v1123_v41 = vpop.f32.mrb[25].mxu0 }
 0x226   :  { %6774 = vmatpush3.bf16.msra.mxu0 %v7096_v25 }
 0x227   :  { %5578 = vmatmul.mubr.f32.vlgmr.msra.gmra.mrb[8].mxu1 %v4730_v36  ;;  %6776 = vmatprep.subr.bf16.mxu0 %v7104_v35 }
 0x228   :  { %5580 = vmatprep.mubr.f32.mxu1 %v4731_v37  ;;  %5584 = vmatpush3.msra.mxu1 %v4733_v34  ;;  %v5628_v42 = vpop.f32.mrb[26].mxu0  ;;  %v4814_v34 = vld [vmem:[%s7859_s4 + $0x60] sm:$0xff] }
 0x229   :  { %5629 = vmatprep.subr.mxu1 %v4742_v39  ;;  %v1133_v43 = vpop.f32.mrb[27].mxu0 }
 0x22a   :  { %6778 = vmatpush3.bf16.msra.mxu0 %v7104_v35 }
 0x22b   :  { %5581 = vmatmul.mubr.f32.gmra.mrb[10].mxu1 %v4732_v38  ;;  %6780 = vmatprep.subr.bf16.mxu0 %v7110_v30 }
 0x22e   :  { %6782 = vmatpush3.bf16.msra.mxu0 %v7110_v30 }
 0x244   :  { %v7427_v45 = vpop.f32.mrb[28].mxu0 }
 0x245   :  { %v1509_v46 = vpop.f32.mrb[29].mxu0 }
 0x248   :  { %v5720_v58 = vpop.f32.mrb[30].mxu0 }
 0x249   :  { %v1519_v59 = vpop.f32.mrb[31].mxu0 }
 0x264   :  { %v5763_v60 = vpop.f32.mrb[32].mxu0 }
 0x265   :  { %v1702_v61 = vpop.f32.mrb[33].mxu0 }
 0x268   :  { %v5766_v63 = vpop.f32.mrb[34].mxu0 }
 0x269   :  { %v1712_v0 = vpop.f32.mrb[35].mxu0 }
 0x284   :  { %v7471_v1 = vpop.f32.mrb[36].mxu0 }
 0x285   :  { %v7473_v2 = vpop.f32.mrb[37].mxu0 }
 0x288   :  { %v5858_v15 = vpop.f32.mrb[38].mxu0 }
 0x289   :  { %v2098_v17 = vpop.f32.mrb[39].mxu0 }
 0x2a4   :  { %v5901_v18 = vpop.f32.mrb[40].mxu0 }
 0x2a5   :  { %v2281_v19 = vpop.f32.mrb[41].mxu0 }
 0x2a8   :  { %v5904_v20 = vpop.f32.mrb[42].mxu0 }
 0x2a9   :  { %v2291_v21 = vpop.f32.mrb[43].mxu0 }
 0x2c4   :  { %v5993_v36 = vpop.f32.mrb[44].mxu0 }
 0x2c5   :  { %v2667_v37 = vpop.f32.mrb[45].mxu0 }
 0x2c8   :  { %v5996_v38 = vpop.f32.mrb[46].mxu0 }
 0x2fa   :  { %v5579_v47 = vpop.f32.mrb[8].mxu1 }
 0x2fb   :  { %v930_v48 = vpop.f32.mrb[9].mxu1 }
 0x2fc   :  { %5585 = vmatprep.mubr.msk.f32.mxu1 %vm471_vm1, %v930_v48  ;;  %v4840_v48 = vld [vmem:[%s7857_s3 + $0x1f8] sm:$0xff] }
 0x2fd   :  { %5586 = vmatmul.mubr.msk.f32.vlgmr.msra.gmra.mrb[4].mxu1 %vm471_vm1, %v5579_v47  ;;  %v4839_v47 = vld [vmem:[%s7857_s3 + $0x1f0] sm:$0xff] }
 0x2fe   :  { %5630 = vmatpush3.msra.mxu1 %v4742_v39  ;;  %v5582_v49 = vpop.f32.mrb[10].mxu1  ;;  %v2677_v39 = vpop.f32.mrb[47].mxu0 }
 0x2ff   :  { %6432 = vmatprep.subr.bf16.mxu1 %v7056_v44  ;;  %v940_v50 = vpop.f32.mrb[11].mxu1 }
 0x300   :  { %5588 = vmatprep.mubr.msk.f32.mxu1 %vm471_vm1, %v940_v50 }
 0x301   :  { %5589 = vmatmul.mubr.msk.f32.gmra.mrb[6].mxu1 %vm471_vm1, %v5582_v49 }
 0x302   :  { %5631 = vmatprep.mubr.msk.f32.mxu1 %vm471_vm1, %v1123_v41  ;;  %v4831_v41 = vld [vmem:[%s7857_s3 + $0x1d8] sm:$0xff] }
 0x305   :  { %5632 = vmatmul.mubr.msk.f32.vlgmr.msra.gmra.mrb[4].mxu1 %vm471_vm1, %v5625_v40  ;;  %v4830_v40 = vld [vmem:[%s7857_s3 + $0x1d0] sm:$0xff] }
 0x306   :  { %6434 = vmatpush3.bf16.msra.mxu1 %v7056_v44  ;;  %5634 = vmatprep.mubr.msk.f32.mxu1 %vm471_vm1, %v1133_v43  ;;  %v7585_v43 = vpop.f32.mrb[48].mxu0 }
 0x307   :  { %6436 = vmatprep.subr.bf16.mxu1 %v7064_v53  ;;  %6086 = vmatprep.mubr.f32.mxu0 %v4830_v40 }
 0x308   :  { %6087 = vmatmul.mubr.f32.gmra.mrb[50].mxu0 %v4831_v41 }
 0x309   :  { %5635 = vmatmul.mubr.msk.f32.gmra.mrb[6].mxu1 %vm471_vm1, %v5628_v42  ;;  %v4837_v42 = vld [vmem:[%s7857_s3 + $0x1e0] sm:$0xff] }
 0x30a   :  { %6438 = vmatpush3.bf16.msra.mxu1 %v7064_v53  ;;  %5669 = vmatprep.mubr.f32.mxu1 %v4747_v51 }
 0x30b   :  { %6440 = vmatprep.subr.bf16.mxu1 %v7072_v62  ;;  %6129 = vmatprep.mubr.f32.mxu0 %v4837_v42 }
 0x30e   :  { %6442 = vmatpush3.bf16.msra.mxu1 %v7072_v62 }
 0x30f   :  { %6444 = vmatprep.subr.bf16.mxu1 %v7080_v7 }
 0x312   :  { %6446 = vmatpush3.bf16.msra.mxu1 %v7080_v7 }
 0x313   :  { %6448 = vmatprep.subr.bf16.mxu1 %v7088_v16 }
 0x316   :  { %6450 = vmatpush3.bf16.msra.mxu1 %v7088_v16 }
 0x317   :  { %6452 = vmatprep.subr.bf16.mxu1 %v7096_v25 }
 0x31a   :  { %6454 = vmatpush3.bf16.msra.mxu1 %v7096_v25 }
 0x31b   :  { %6456 = vmatprep.subr.bf16.mxu1 %v7104_v35 }
 0x31e   :  { %6458 = vmatpush3.bf16.msra.mxu1 %v7104_v35 }
 0x31f   :  { %6460 = vmatprep.subr.bf16.mxu1 %v7110_v30 }
 0x322   :  { %6462 = vmatpush3.bf16.msra.mxu1 %v7110_v30 }
 0x323   :  { %5675 = vmatprep.subr.mxu1 %v4751_v52 }
 0x325   :  { %5670 = vmatmul.mubr.f32.vlgmr.msra.gmra.mrb[12].mxu1 %v4748_v54  ;;  %v4819_v54 = vld [vmem:[%s7857_s3 + $0x1a0] sm:$0xff] }
 0x326   :  { %5672 = vmatprep.mubr.f32.mxu1 %v4749_v55  ;;  %5676 = vmatpush3.msra.mxu1 %v4751_v52 }
 0x327   :  { %5721 = vmatprep.subr.mxu1 %v4760_v57 }
 0x329   :  { %5673 = vmatmul.mubr.f32.gmra.mrb[14].mxu1 %v4750_v56 }
 0x3f8   :  { %v5671_v3 = vpop.f32.mrb[12].mxu1 }
 0x3f9   :  { %v1316_v4 = vpop.f32.mrb[13].mxu1 }
 0x3fa   :  { %5677 = vmatprep.mubr.msk.f32.mxu1 %vm471_vm1, %v1316_v4  ;;  %v4848_v4 = vld [vmem:[%s7860_s7 + $0x10] sm:$0xff] }
 0x3fb   :  { %5678 = vmatmul.mubr.msk.f32.vlgmr.msra.gmra.mrb[4].mxu1 %vm471_vm1, %v5671_v3  ;;  %v6900_v3 = vmov 0.0|0.0  }
 0x3fc   :  { %5722 = vmatpush3.msra.mxu1 %v4760_v57  ;;  %v5674_v6 = vpop.f32.mrb[14].mxu1  ;;  %6795 = vmatprep.subr.bf16.mxu0 %v6900_v3 }
 0x3fd   :  { %v1326_v8 = vpop.f32.mrb[15].mxu1  ;;  %5767 = vmatprep.subr.mxu1 %v4769_v5 }
 0x3fe   :  { %5680 = vmatprep.mubr.msk.f32.mxu1 %vm471_vm1, %v1326_v8  ;;  %v6902_v8 = vmov 0.0  }
 0x3ff   :  { %5681 = vmatmul.mubr.msk.f32.gmra.mrb[6].mxu1 %vm471_vm1, %v5674_v6 }
 0x400   :  { %5723 = vmatprep.mubr.msk.f32.mxu1 %vm471_vm1, %v1509_v46  ;;  %v4838_v46 = vld [vmem:[%s7857_s3 + $0x1e8] sm:$0xff] }
 0x401   :  { %6130 = vmatmul.mubr.f32.vlgmr.msra.gmra.mrb[52].mxu0 %v4838_v46 }
 0x402   :  { %6132 = vmatprep.mubr.f32.mxu0 %v4839_v47 }
 0x403   :  { %5724 = vmatmul.mubr.msk.f32.vlgmr.msra.gmra.mrb[4].mxu1 %vm471_vm1, %v7427_v45  ;;  %v7587_v45 = vpop.f32.mrb[49].mxu0 }
 0x404   :  { %5768 = vmatpush3.msra.mxu1 %v4769_v5  ;;  %5726 = vmatprep.mubr.msk.f32.mxu1 %vm471_vm1, %v1519_v59  ;;  %v4849_v5 = vld [vmem:[%s7860_s7 + $0x18] sm:$0xff] }
 0x405   :  { %6528 = vmatprep.subr.bf16.mxu1 %v7056_v44  ;;  %6133 = vmatmul.mubr.f32.gmra.mrb[54].mxu0 %v4840_v48  ;;  %v6784_v6 = vpack.c.bf16 %v4849_v5, %v4848_v4 }
 0x406   :  { %6175 = vmatprep.mubr.msk.f32.mxu0 %vm6901_vm2, %v6902_v8 }
 0x407   :  { %5727 = vmatmul.mubr.msk.f32.gmra.mrb[6].mxu1 %vm471_vm1, %v5720_v58 }
 0x408   :  { %5769 = vmatprep.mubr.msk.f32.mxu1 %vm471_vm1, %v1702_v61 }
 0x40b   :  { %5770 = vmatmul.mubr.msk.f32.vlgmr.msra.gmra.mrb[4].mxu1 %vm471_vm1, %v5763_v60  ;;  %v4841_v60 = vld [vmem:[%s7859_s4 + $0x78] sm:$0xff] }
 0x40c   :  { %6530 = vmatpush3.bf16.msra.mxu1 %v7056_v44  ;;  %5772 = vmatprep.mubr.msk.f32.mxu1 %vm471_vm1, %v1712_v0  ;;  %v4858_v0 = vld [vmem:[%s7860_s7 + $0x40] sm:$0xff] }
 0x40d   :  { %6532 = vmatprep.subr.bf16.mxu1 %v7064_v53 }
 0x40f   :  { %5773 = vmatmul.mubr.msk.f32.gmra.mrb[6].mxu1 %vm471_vm1, %v5766_v63 }
 0x410   :  { %6534 = vmatpush3.bf16.msra.mxu1 %v7064_v53  ;;  %5807 = vmatprep.mubr.f32.mxu1 %v4774_v9 }
 0x411   :  { %6536 = vmatprep.subr.bf16.mxu1 %v7072_v62 }
 0x414   :  { %6538 = vmatpush3.bf16.msra.mxu1 %v7072_v62 }
 0x415   :  { %6540 = vmatprep.subr.bf16.mxu1 %v7080_v7 }
 0x418   :  { %6542 = vmatpush3.bf16.msra.mxu1 %v7080_v7 }
 0x419   :  { %6544 = vmatprep.subr.bf16.mxu1 %v7088_v16 }
 0x41c   :  { %6546 = vmatpush3.bf16.msra.mxu1 %v7088_v16 }
 0x41d   :  { %6548 = vmatprep.subr.bf16.mxu1 %v7096_v25 }
 0x420   :  { %6550 = vmatpush3.bf16.msra.mxu1 %v7096_v25 }
 0x421   :  { %6552 = vmatprep.subr.bf16.mxu1 %v7104_v35 }
 0x424   :  { %6554 = vmatpush3.bf16.msra.mxu1 %v7104_v35 }
 0x425   :  { %6556 = vmatprep.subr.bf16.mxu1 %v7110_v30 }
 0x428   :  { %6558 = vmatpush3.bf16.msra.mxu1 %v7110_v30 }
 0x429   :  { %5813 = vmatprep.subr.mxu1 %v4778_v10 }
 0x42b   :  { %5808 = vmatmul.mubr.f32.vlgmr.msra.gmra.mrb[16].mxu1 %v4775_v11 }
 0x42c   :  { %5810 = vmatprep.mubr.f32.mxu1 %v4776_v12  ;;  %5814 = vmatpush3.msra.mxu1 %v4778_v10 }
 0x42d   :  { %5859 = vmatprep.subr.mxu1 %v4787_v14 }
 0x42f   :  { %5811 = vmatmul.mubr.f32.gmra.mrb[18].mxu1 %v4777_v13 }
 0x4fe   :  { %v5809_v22 = vpop.f32.mrb[16].mxu1 }
 0x4ff   :  { %v1895_v23 = vpop.f32.mrb[17].mxu1 }
 0x500   :  { %5815 = vmatprep.mubr.msk.f32.mxu1 %vm471_vm1, %v1895_v23 }
 0x501   :  { %5816 = vmatmul.mubr.msk.f32.vlgmr.msra.gmra.mrb[4].mxu1 %vm471_vm1, %v5809_v22 }
 0x502   :  { %5860 = vmatpush3.msra.mxu1 %v4787_v14  ;;  %v5812_v26 = vpop.f32.mrb[18].mxu1 }
 0x503   :  { %v1905_v27 = vpop.f32.mrb[19].mxu1  ;;  %5905 = vmatprep.subr.mxu1 %v4796_v24 }
 0x504   :  { %5818 = vmatprep.mubr.msk.f32.mxu1 %vm471_vm1, %v1905_v27 }
 0x505   :  { %5819 = vmatmul.mubr.msk.f32.gmra.mrb[6].mxu1 %vm471_vm1, %v5812_v26 }
 0x506   :  { %5861 = vmatprep.mubr.msk.f32.mxu1 %vm471_vm1, %v7473_v2 }
 0x509   :  { %5862 = vmatmul.mubr.msk.f32.vlgmr.msra.gmra.mrb[4].mxu1 %vm471_vm1, %v7471_v1  ;;  %v4859_v1 = vld [vmem:[%s7860_s7 + $0x48] sm:$0xff] }
 0x50a   :  { %5906 = vmatpush3.msra.mxu1 %v4796_v24  ;;  %5864 = vmatprep.mubr.msk.f32.mxu1 %vm471_vm1, %v2098_v17  ;;  %v6796_v2 = vpack.c.bf16 %v4859_v1, %v4858_v0  ;;  %v3442_v1 = vld [vmem:[%s7860_s7] sm:$0xff] }
 0x50b   :  { %6624 = vmatprep.subr.bf16.mxu1 %v7056_v44 }
 0x50c   :  { %6797 = vmatpush3.bf16.msra.mxu0 %v6796_v2  ;;  %v3443_v2 = vld [vmem:[%s7860_s7 + $0x8] sm:$0xff] }
 0x50d   :  { %5865 = vmatmul.mubr.msk.f32.gmra.mrb[6].mxu1 %vm471_vm1, %v5858_v15  ;;  %6801 = vmatprep.subr.bf16.mxu0 %v6900_v3 }
 0x50e   :  { %5907 = vmatprep.mubr.msk.f32.mxu1 %vm471_vm1, %v2281_v19 }
 0x511   :  { %5908 = vmatmul.mubr.msk.f32.vlgmr.msra.gmra.mrb[4].mxu1 %vm471_vm1, %v5901_v18 }
 0x512   :  { %6626 = vmatpush3.bf16.msra.mxu1 %v7056_v44  ;;  %5910 = vmatprep.mubr.msk.f32.mxu1 %vm471_vm1, %v2291_v21 }
 0x513   :  { %6628 = vmatprep.subr.bf16.mxu1 %v7064_v53 }
 0x515   :  { %5911 = vmatmul.mubr.msk.f32.gmra.mrb[6].mxu1 %vm471_vm1, %v5904_v20 }
 0x516   :  { %6630 = vmatpush3.bf16.msra.mxu1 %v7064_v53  ;;  %5945 = vmatprep.mubr.f32.mxu1 %v4801_v28 }
 0x517   :  { %6632 = vmatprep.subr.bf16.mxu1 %v7072_v62 }
 0x51a   :  { %6634 = vmatpush3.bf16.msra.mxu1 %v7072_v62 }
 0x51b   :  { %6636 = vmatprep.subr.bf16.mxu1 %v7080_v7 }
 0x51e   :  { %6638 = vmatpush3.bf16.msra.mxu1 %v7080_v7 }
 0x51f   :  { %6640 = vmatprep.subr.bf16.mxu1 %v7088_v16 }
 0x522   :  { %6642 = vmatpush3.bf16.msra.mxu1 %v7088_v16 }
 0x523   :  { %6644 = vmatprep.subr.bf16.mxu1 %v7096_v25 }
 0x526   :  { %6646 = vmatpush3.bf16.msra.mxu1 %v7096_v25 }
 0x527   :  { %6648 = vmatprep.subr.bf16.mxu1 %v7104_v35 }
 0x52a   :  { %6650 = vmatpush3.bf16.msra.mxu1 %v7104_v35 }
 0x52b   :  { %6652 = vmatprep.subr.bf16.mxu1 %v7110_v30 }
 0x52e   :  { %6654 = vmatpush3.bf16.msra.mxu1 %v7110_v30 }
 0x52f   :  { %5951 = vmatprep.subr.mxu1 %v4805_v29 }
 0x531   :  { %5946 = vmatmul.mubr.f32.vlgmr.msra.gmra.mrb[20].mxu1 %v4802_v31 }
 0x532   :  { %5948 = vmatprep.mubr.f32.mxu1 %v4803_v32  ;;  %5952 = vmatpush3.msra.mxu1 %v4805_v29 }
 0x533   :  { %5997 = vmatprep.subr.mxu1 %v4814_v34 }
 0x535   :  { %5949 = vmatmul.mubr.f32.gmra.mrb[22].mxu1 %v4804_v33 }
 0x604   :  { %v5947_v49 = vpop.f32.mrb[20].mxu1 }
 0x605   :  { %v2474_v50 = vpop.f32.mrb[21].mxu1 }
 0x606   :  { %5953 = vmatprep.mubr.msk.f32.mxu1 %vm471_vm1, %v2474_v50 }
 0x607   :  { %5954 = vmatmul.mubr.msk.f32.vlgmr.msra.gmra.mrb[4].mxu1 %vm471_vm1, %v5947_v49 }
 0x608   :  { %5998 = vmatpush3.msra.mxu1 %v4814_v34  ;;  %v5950_v51 = vpop.f32.mrb[22].mxu1 }
 0x609   :  { %6688 = vmatprep.subr.bf16.mxu1 %v7056_v44  ;;  %v2484_v52 = vpop.f32.mrb[23].mxu1 }
 0x60a   :  { %5956 = vmatprep.mubr.msk.f32.mxu1 %vm471_vm1, %v2484_v52 }
 0x60b   :  { %5957 = vmatmul.mubr.msk.f32.gmra.mrb[6].mxu1 %vm471_vm1, %v5950_v51 }
 0x60c   :  { %5999 = vmatprep.mubr.msk.f32.mxu1 %vm471_vm1, %v2667_v37 }
 0x60f   :  { %6000 = vmatmul.mubr.msk.f32.vlgmr.msra.gmra.mrb[4].mxu1 %vm471_vm1, %v5993_v36 }
 0x610   :  { %6690 = vmatpush3.bf16.msra.mxu1 %v7056_v44  ;;  %6002 = vmatprep.mubr.msk.f32.mxu1 %vm471_vm1, %v2677_v39  ;;  %v4823_v44 = vld [vmem:[%s7859_s4 + $0x68] sm:$0xff] }
 0x611   :  { %6692 = vmatprep.subr.bf16.mxu1 %v7064_v53 }
 0x613   :  { %6003 = vmatmul.mubr.msk.f32.gmra.mrb[6].mxu1 %vm471_vm1, %v5996_v38 }
 0x614   :  { %6694 = vmatpush3.bf16.msra.mxu1 %v7064_v53  ;;  %6037 = vmatprep.mubr.f32.mxu1 %v4819_v54  ;;  %v4820_v53 = vld [vmem:[%s7857_s3 + $0x1a8] sm:$0xff] }
 0x615   :  { %6696 = vmatprep.subr.bf16.mxu1 %v7072_v62 }
 0x618   :  { %6698 = vmatpush3.bf16.msra.mxu1 %v7072_v62  ;;  %v4821_v62 = vld [vmem:[%s7857_s3 + $0x1b0] sm:$0xff] }
 0x619   :  { %6700 = vmatprep.subr.bf16.mxu1 %v7080_v7 }
 0x61c   :  { %6702 = vmatpush3.bf16.msra.mxu1 %v7080_v7  ;;  %v4822_v7 = vld [vmem:[%s7857_s3 + $0x1b8] sm:$0xff] }
 0x61d   :  { %6704 = vmatprep.subr.bf16.mxu1 %v7088_v16 }
 0x620   :  { %6706 = vmatpush3.bf16.msra.mxu1 %v7088_v16  ;;  %v4832_v16 = vld [vmem:[%s7859_s4 + $0x70] sm:$0xff] }
 0x621   :  { %6708 = vmatprep.subr.bf16.mxu1 %v7096_v25 }
 0x624   :  { %6710 = vmatpush3.bf16.msra.mxu1 %v7096_v25  ;;  %v6088_v25 = vpop.f32.mrb[50].mxu0 }
 0x625   :  { %6712 = vmatprep.subr.bf16.mxu1 %v7104_v35 }
 0x628   :  { %6714 = vmatpush3.bf16.msra.mxu1 %v7104_v35  ;;  %v3063_v35 = vpop.f32.mrb[51].mxu0 }
 0x629   :  { %6716 = vmatprep.subr.bf16.mxu1 %v7110_v30 }
 0x62c   :  { %6718 = vmatpush3.bf16.msra.mxu1 %v7110_v30  ;;  %v6131_v30 = vpop.f32.mrb[52].mxu0 }
 0x62d   :  { %6043 = vmatprep.subr.mxu1 %v4823_v44  ;;  %v3246_v55 = vpop.f32.mrb[53].mxu0 }
 0x62e   :  { %v6134_v56 = vpop.f32.mrb[54].mxu0 }
 0x62f   :  { %6038 = vmatmul.mubr.f32.vlgmr.msra.gmra.mrb[24].mxu1 %v4820_v53  ;;  %v3256_v57 = vpop.f32.mrb[55].mxu0 }
 0x630   :  { %6040 = vmatprep.mubr.f32.mxu1 %v4821_v62  ;;  %6044 = vmatpush3.msra.mxu1 %v4823_v44  ;;  %v4846_v62 = vld [vmem:[%s7861_s5] ss:$0 sm:$0xff] }
 0x631   :  { %6089 = vmatprep.subr.mxu1 %v4832_v16 }
 0x633   :  { %6041 = vmatmul.mubr.f32.gmra.mrb[26].mxu1 %v4822_v7 }
 0x702   :  { %v6039_v58 = vpop.f32.mrb[24].mxu1 }
 0x703   :  { %v2860_v59 = vpop.f32.mrb[25].mxu1 }
 0x704   :  { %6045 = vmatprep.mubr.msk.f32.mxu1 %vm471_vm1, %v2860_v59 }
 0x705   :  { %6046 = vmatmul.mubr.msk.f32.vlgmr.msra.gmra.mrb[4].mxu1 %vm471_vm1, %v6039_v58 }
 0x706   :  { %6090 = vmatpush3.msra.mxu1 %v4832_v16  ;;  %v6042_v61 = vpop.f32.mrb[26].mxu1 }
 0x707   :  { %v2870_v63 = vpop.f32.mrb[27].mxu1  ;;  %6135 = vmatprep.subr.mxu1 %v4841_v60 }
 0x708   :  { %6048 = vmatprep.mubr.msk.f32.mxu1 %vm471_vm1, %v2870_v63 }
 0x709   :  { %6049 = vmatmul.mubr.msk.f32.gmra.mrb[6].mxu1 %vm471_vm1, %v6042_v61  ;;  %v4865_v61 = vld [vmem:[%s7860_s7 + $0x68] sm:$0xff] }
 0x70a   :  { %6091 = vmatprep.mubr.msk.f32.mxu1 %vm471_vm1, %v7587_v45 }
 0x70d   :  { %6092 = vmatmul.mubr.msk.f32.vlgmr.msra.gmra.mrb[4].mxu1 %vm471_vm1, %v7585_v43 }
 0x70e   :  { %6136 = vmatpush3.msra.mxu1 %v4841_v60  ;;  %6094 = vmatprep.mubr.msk.f32.mxu1 %vm471_vm1, %v3063_v35  ;;  %v4864_v60 = vld [vmem:[%s7860_s7 + $0x60] sm:$0xff] }
 0x70f   :  { %6783 = vmatprep.subr.bf16.mxu1 %v6900_v3  ;;  %v6802_v4 = vpack.c.bf16 %v4865_v61, %v4864_v60 }
 0x711   :  { %6095 = vmatmul.mubr.msk.f32.gmra.mrb[6].mxu1 %vm471_vm1, %v6088_v25 }
 0x712   :  { %6137 = vmatprep.mubr.msk.f32.mxu1 %vm471_vm1, %v3246_v55 }
 0x715   :  { %6138 = vmatmul.mubr.msk.f32.vlgmr.msra.gmra.mrb[4].mxu1 %vm471_vm1, %v6131_v30  ;;  %v4847_v30 = vld [vmem:[%s7862_s6] ss:$0 sm:$0xff] }
 0x716   :  { %6140 = vmatprep.mubr.msk.f32.mxu1 %vm471_vm1, %v3256_v57  ;;  %6785 = vmatpush3.bf16.msra.mxu1 %v6784_v6 }
 0x717   :  { %6786 = vmatprep.subr.bf16.mxu1 %v6900_v3 }
 0x719   :  { %6141 = vmatmul.mubr.msk.f32.gmra.mrb[6].mxu1 %vm471_vm1, %v6134_v56 }
 0x71a   :  { %6147 = vmatprep.mubr.msk.f32.mxu1 %vm6901_vm2, %v6902_v8 }
 0x7e8   :  { %v6139_v9 = vpop.f32.mrb[4].mxu1 }
 0x7e9   :  { %v3370_v10 = vsel %vm3368_vm3, %v6139_v9, 0.0  ;;  %v3345_v11 = vpop.f32.mrb[5].mxu1 }
 0x7ea   :  { %v3369_v12 = vsel %vm3368_vm3, %v3345_v11, 0.0 }
 0x7eb   :  { %v3371_v13 = vadd.f32 %v3370_v10, %v3369_v12  ;;  %v4870_v10 = vld [vmem:[%s7860_s7 + $0x80] sm:$0xff]  ;;  %v6787_v12 = vpack.c.bf16 %v3443_v2, %v3442_v1 }
 0x7ec   :  { %v6142_v14 = vpop.f32.mrb[6].mxu1 }
 0x7ed   :  { %v3355_v15 = vpop.f32.mrb[7].mxu1  ;;  %v3374_v19 = vsel %vm3368_vm3, %v6142_v14, 0.0 }
 0x7ee   :  { %v3372_v17 = vsel %vm3368_vm3, %v3355_v15, 0.0 }
 0x7ef   :  { %v3373_v18 = vadd.f32 %v3372_v17, %v3371_v13 }
 0x7f1   :  { %v3375_v20 = vadd.f32 %v3374_v19, %v3373_v18 }
 0x7f3   :  { %v3376_v21 = vrot.slane %v3375_v20, 4 }
 0x7f5   :  { %v3377_v22 = vadd.f32 %v3376_v21, %v3375_v20  ;;  %v4876_v21 = vld [vmem:[%s7860_s7 + $0xa0] sm:$0xff] }
 0x7f7   :  { %v3378_v23 = vrot.slane %v3377_v22, 2 }
 0x7f9   :  { %v3379_v24 = vadd.f32 %v3378_v23, %v3377_v22  ;;  %v4877_v22 = vld [vmem:[%s7860_s7 + $0xa8] sm:$0xff] }
 0x7fb   :  { %v3380_v26 = vrot.slane %v3379_v24, 1 }
 0x7fd   :  { %v3381_v27 = vadd.f32 %v3380_v26, %v3379_v24  ;;  %v4855_v24 = vld [vmem:[%s7860_s7 + $0x30] sm:$0xff]  ;;  %v4856_v26 = vld [vmem:[%s7860_s7 + $0x38] sm:$0xff] }
 0x7ff   :  { %v3383_v28 = vmul.f32 0.03125, %v3381_v27  ;;  %v6814_v27 = vpack.c.bf16 %v4877_v22, %v4876_v21 }
 0x801   :  { %v3384_v29 = vsub.f32 %v3345_v11, %v3383_v28  ;;  %v3385_v31 = vsub.f32 %v6139_v9, %v3383_v28  ;;  %v3386_v32 = vsub.f32 %v3355_v15, %v3383_v28  ;;  %v3387_v33 = vsub.f32 %v6142_v14, %v3383_v28  ;;  %v4871_v11 = vld [vmem:[%s7860_s7 + $0x88] sm:$0xff]  ;;  %v4852_v14 = vld [vmem:[%s7860_s7 + $0x20] sm:$0xff] }
 0x802   :  { %v4853_v15 = vld [vmem:[%s7860_s7 + $0x28] sm:$0xff]  ;;  %v6808_v17 = vpack.c.bf16 %v4871_v11, %v4870_v10 }
 0x803   :  { %v3388_v34 = vmul.f32 %v3384_v29, %v3384_v29  ;;  %v3389_v36 = vmul.f32 %v3385_v31, %v3385_v31  ;;  %v3390_v37 = vmul.f32 %v3386_v32, %v3386_v32  ;;  %v3391_v38 = vmul.f32 %v3387_v33, %v3387_v33 }
 0x804   :  { %v6790_v23 = vpack.c.bf16 %v4853_v15, %v4852_v14 }
 0x805   :  { %v3392_v39 = vsel %vm3368_vm3, %v3388_v34, 0.0  ;;  %v3393_v40 = vsel %vm3368_vm3, %v3389_v36, 0.0  ;;  %v3395_v42 = vsel %vm3368_vm3, %v3390_v37, 0.0  ;;  %v3397_v45 = vsel %vm3368_vm3, %v3391_v38, 0.0  ;;  %v4861_v36 = vld [vmem:[%s7860_s7 + $0x50] sm:$0xff]  ;;  %v4862_v37 = vld [vmem:[%s7860_s7 + $0x58] sm:$0xff] }
 0x806   :  { %v3394_v41 = vadd.f32 %v3393_v40, %v3392_v39 }
 0x808   :  { %v3396_v43 = vadd.f32 %v3395_v42, %v3394_v41  ;;  %v4888_v41 = vld [vmem:[%s7860_s7 + $0xe0] sm:$0xff]  ;;  %v4889_v42 = vld [vmem:[%s7860_s7 + $0xe8] sm:$0xff] }
 0x80a   :  { %v3398_v46 = vadd.f32 %v3397_v45, %v3396_v43  ;;  %v6799_v43 = vpack.c.bf16 %v4862_v37, %v4861_v36 }
 0x80c   :  { %v3399_v47 = vrot.slane %v3398_v46, 4 }
 0x80e   :  { %v3400_v48 = vadd.f32 %v3399_v47, %v3398_v46  ;;  %v4867_v46 = vld [vmem:[%s7860_s7 + $0x70] sm:$0xff]  ;;  %v4868_v47 = vld [vmem:[%s7860_s7 + $0x78] sm:$0xff] }
 0x810   :  { %v3401_v49 = vrot.slane %v3400_v48, 2 }
 0x812   :  { %v3402_v50 = vadd.f32 %v3401_v49, %v3400_v48  ;;  %v6826_v48 = vpack.c.bf16 %v4889_v42, %v4888_v41 }
 0x814   :  { %v3403_v51 = vrot.slane %v3402_v50, 1 }
 0x816   :  { %v3404_v52 = vadd.f32 %v3403_v51, %v3402_v50  ;;  %v6805_v50 = vpack.c.bf16 %v4868_v47, %v4867_v46 }
 0x818   :  { %v3405_v54 = vmul.f32 0.03125, %v3404_v52  ;;  %v4873_v52 = vld [vmem:[%s7860_s7 + $0x90] sm:$0xff] }
 0x81a   :  { %v3406_v44 = vadd.f32 1e-05, %v3405_v54  ;;  %v4874_v54 = vld [vmem:[%s7860_s7 + $0x98] sm:$0xff] }
 0x81c   :  { %6894 = vrsqrt.f32 %v3406_v44 }
 0x826   :  { %v6895_v53 = vpop.eup %6894 }
 0x827   :  { %v3408_v7 = vmul.f32 %v6895_v53, %v3384_v29  ;;  %v3409_v16 = vmul.f32 %v6895_v53, %v3385_v31  ;;  %v3410_v25 = vmul.f32 %v6895_v53, %v3386_v32  ;;  %v3411_v35 = vmul.f32 %v6895_v53, %v3387_v33  ;;  %v4882_v29 = vld [vmem:[%s7860_s7 + $0xc0] sm:$0xff]  ;;  %v4883_v31 = vld [vmem:[%s7860_s7 + $0xc8] sm:$0xff] }
 0x828   :  { %v6793_v33 = vpack.c.bf16 %v4856_v26, %v4855_v24  ;;  %v6820_v38 = vpack.c.bf16 %v4883_v31, %v4882_v29  ;;  %v6811_v53 = vpack.c.bf16 %v4874_v54, %v4873_v52 }
 0x829   :  { %v3419_v55 = vmul.f32 %v4846_v62, %v3408_v7  ;;  %v3420_v56 = vmul.f32 %v4846_v62, %v3409_v16  ;;  %v3421_v57 = vmul.f32 %v4846_v62, %v3410_v25  ;;  %v3422_v18 = vmul.f32 %v4846_v62, %v3411_v35  ;;  %v4879_v7 = vld [vmem:[%s7860_s7 + $0xb0] sm:$0xff]  ;;  %v4880_v16 = vld [vmem:[%s7860_s7 + $0xb8] sm:$0xff] }
 0x82a   :  { %v6817_v25 = vpack.c.bf16 %v4880_v16, %v4879_v7 }
 0x82b   :  { %v3430_v58 = vadd.f32 %v4847_v30, %v3419_v55  ;;  %v3431_v59 = vadd.f32 %v4847_v30, %v3420_v56  ;;  %v3432_v5 = vadd.f32 %v4847_v30, %v3421_v57  ;;  %v3433_v32 = vadd.f32 %v4847_v30, %v3422_v18  ;;  %v4885_v30 = vld [vmem:[%s7860_s7 + $0xd0] sm:$0xff]  ;;  %v4886_v55 = vld [vmem:[%s7860_s7 + $0xd8] sm:$0xff] }
 0x82c   :  { %v6823_v56 = vpack.c.bf16 %v4886_v55, %v4885_v30 }
 0x82d   :  { %v3434_v63 = vmul.f32 0.2, %v3430_v58  ;;  %v3435_v0 = vmul.f32 0.2, %v3431_v59  ;;  %v3436_v19 = vmul.f32 0.2, %v3432_v5 }
 0x82e   :  { %v3437_v40 = vmul.f32 0.2, %v3433_v32 }
 0x82f   :  { %v7703_v6 = vmax.f32 %v3430_v58, %v3434_v63  ;;  %v7705_v9 = vmax.f32 %v3431_v59, %v3435_v0  ;;  %v7745_v28 = vmax.f32 %v3432_v5, %v3436_v19  ;;  %v4891_v58 = vld [vmem:[%s7860_s7 + $0xf0] sm:$0xff]  ;;  %v4892_v59 = vld [vmem:[%s7860_s7 + $0xf8] sm:$0xff] }
 0x830   :  { %v3441_v49 = vmax.f32 %v3433_v32, %v3437_v40  ;;  %v6829_v60 = vpack.c.bf16 %v4892_v59, %v4891_v58 }
 0x831   :  { %6176 = vmatmul.mubr.msk.f32.vlgmr.msra.gmra.mrb[56].mxu0 %vm3368_vm3, %v7705_v9  ;;  %v3448_v13 = vrot.slane %v7703_v6, 2  ;;  %v3904_v20 = vrot.slane %v7705_v9, 4  ;;  %v3596_v34 = vrot.slane %v7703_v6, 4  ;;  %v4212_v39 = vrot.slane %v7745_v28, 4 }
 0x832   :  { %6803 = vmatpush3.bf16.msra.mxu0 %v6802_v4  ;;  %6189 = vmatprep.mubr.msk.f32.mxu0 %vm6901_vm2, %v6902_v8  ;;  %v3673_v45 = vrot.slane %v7703_v6, 6  ;;  %v3827_v51 = vrot.slane %v7705_v9, 2  ;;  %v4520_v44 = vrot.slane %v3441_v49, 4  ;;  %v3981_v62 = vrot.slane %v7705_v9, 6 }
 0x833   :  { %6148 = vmatmul.mubr.msk.f32.vlgmr.msra.gmra.mrb[28].mxu1 %vm3368_vm3, %v3448_v13  ;;  %6807 = vmatprep.subr.bf16.mxu0 %v6900_v3  ;;  %v4135_v35 = vrot.slane %v7745_v28, 2  ;;  %v4289_v57 = vrot.slane %v7745_v28, 6  ;;  %v4443_v61 = vrot.slane %v3441_v49, 2  ;;  %v4597_v63 = vrot.slane %v3441_v49, 6 }
 0x834   :  { %6788 = vmatpush3.bf16.msra.mxu1 %v6787_v12  ;;  %6154 = vmatprep.mubr.msk.f32.mxu1 %vm6901_vm2, %v6902_v8 }
 0x835   :  { %6190 = vmatmul.mubr.msk.f32.vlgmr.msra.gmra.mrb[58].mxu0 %vm3368_vm3, %v3904_v20  ;;  %6789 = vmatprep.subr.bf16.mxu1 %v6900_v3 }
 0x836   :  { %6809 = vmatpush3.bf16.msra.mxu0 %v6808_v17  ;;  %6203 = vmatprep.mubr.msk.f32.mxu0 %vm6901_vm2, %v6902_v8 }
 0x837   :  { %6155 = vmatmul.mubr.msk.f32.vlgmr.msra.gmra.mrb[30].mxu1 %vm3368_vm3, %v7703_v6  ;;  %6813 = vmatprep.subr.bf16.mxu0 %v6900_v3 }
 0x838   :  { %6791 = vmatpush3.bf16.msra.mxu1 %v6790_v23  ;;  %6161 = vmatprep.mubr.msk.f32.mxu1 %vm6901_vm2, %v6902_v8 }
 0x839   :  { %6204 = vmatmul.mubr.msk.f32.vlgmr.msra.gmra.mrb[60].mxu0 %vm3368_vm3, %v7745_v28  ;;  %6792 = vmatprep.subr.bf16.mxu1 %v6900_v3 }
 0x83a   :  { %6815 = vmatpush3.bf16.msra.mxu0 %v6814_v27  ;;  %6217 = vmatprep.mubr.msk.f32.mxu0 %vm6901_vm2, %v6902_v8 }
 0x83b   :  { %6162 = vmatmul.mubr.msk.f32.vlgmr.msra.gmra.mrb[32].mxu1 %vm3368_vm3, %v3596_v34  ;;  %6819 = vmatprep.subr.bf16.mxu0 %v6900_v3 }
 0x83c   :  { %6794 = vmatpush3.bf16.msra.mxu1 %v6793_v33  ;;  %6168 = vmatprep.mubr.msk.f32.mxu1 %vm6901_vm2, %v6902_v8 }
 0x83d   :  { %6218 = vmatmul.mubr.msk.f32.vlgmr.msra.gmra.mrb[62].mxu0 %vm3368_vm3, %v4212_v39  ;;  %6798 = vmatprep.subr.bf16.mxu1 %v6900_v3 }
 0x83e   :  { %6821 = vmatpush3.bf16.msra.mxu0 %v6820_v38  ;;  %6231 = vmatprep.mubr.msk.f32.mxu0 %vm6901_vm2, %v6902_v8 }
 0x83f   :  { %6169 = vmatmul.mubr.msk.f32.vlgmr.msra.gmra.mrb[34].mxu1 %vm3368_vm3, %v3673_v45  ;;  %6825 = vmatprep.subr.bf16.mxu0 %v6900_v3 }
 0x840   :  { %6800 = vmatpush3.bf16.msra.mxu1 %v6799_v43  ;;  %6182 = vmatprep.mubr.msk.f32.mxu1 %vm6901_vm2, %v6902_v8 }
 0x841   :  { %6232 = vmatmul.mubr.msk.f32.vlgmr.msra.gmra.mrb[64].mxu0 %vm3368_vm3, %v3441_v49  ;;  %6804 = vmatprep.subr.bf16.mxu1 %v6900_v3 }
 0x842   :  { %6827 = vmatpush3.bf16.msra.mxu0 %v6826_v48  ;;  %6245 = vmatprep.mubr.msk.f32.mxu0 %vm6901_vm2, %v6902_v8 }
 0x843   :  { %6183 = vmatmul.mubr.msk.f32.vlgmr.msra.gmra.mrb[36].mxu1 %vm3368_vm3, %v3827_v51  ;;  %v4894_v51 = vld [vmem:[%s7863_s8] ss:$0 sm:$0xff] }
 0x844   :  { %6806 = vmatpush3.bf16.msra.mxu1 %v6805_v50  ;;  %6196 = vmatprep.mubr.msk.f32.mxu1 %vm6901_vm2, %v6902_v8 }
 0x845   :  { %6246 = vmatmul.mubr.msk.f32.vlgmr.msra.gmra.mrb[66].mxu0 %vm3368_vm3, %v4520_v44  ;;  %6810 = vmatprep.subr.bf16.mxu1 %v6900_v3 }
 0x847   :  { %6197 = vmatmul.mubr.msk.f32.vlgmr.msra.gmra.mrb[38].mxu1 %vm3368_vm3, %v3981_v62 }
 0x848   :  { %6812 = vmatpush3.bf16.msra.mxu1 %v6811_v53  ;;  %6210 = vmatprep.mubr.msk.f32.mxu1 %vm6901_vm2, %v6902_v8 }
 0x849   :  { %6816 = vmatprep.subr.bf16.mxu1 %v6900_v3 }
 0x84b   :  { %6211 = vmatmul.mubr.msk.f32.vlgmr.msra.gmra.mrb[40].mxu1 %vm3368_vm3, %v4135_v35 }
 0x84c   :  { %6818 = vmatpush3.bf16.msra.mxu1 %v6817_v25  ;;  %6224 = vmatprep.mubr.msk.f32.mxu1 %vm6901_vm2, %v6902_v8 }
 0x84d   :  { %6822 = vmatprep.subr.bf16.mxu1 %v6900_v3 }
 0x84f   :  { %6225 = vmatmul.mubr.msk.f32.vlgmr.msra.gmra.mrb[42].mxu1 %vm3368_vm3, %v4289_v57 }
 0x850   :  { %6824 = vmatpush3.bf16.msra.mxu1 %v6823_v56  ;;  %6238 = vmatprep.mubr.msk.f32.mxu1 %vm6901_vm2, %v6902_v8 }
 0x851   :  { %6828 = vmatprep.subr.bf16.mxu1 %v6900_v3 }
 0x853   :  { %6239 = vmatmul.mubr.msk.f32.vlgmr.msra.gmra.mrb[44].mxu1 %vm3368_vm3, %v4443_v61 }
 0x854   :  { %6830 = vmatpush3.bf16.msra.mxu1 %v6829_v60  ;;  %6252 = vmatprep.mubr.msk.f32.mxu1 %vm6901_vm2, %v6902_v8 }
 0x857   :  { %6253 = vmatmul.mubr.msk.f32.vlgmr.msra.gmra.mrb[46].mxu1 %vm3368_vm3, %v4597_v63 }
 0x904   :  { %v3819_v0 = vpop.f32.mrb[56].mxu0 }
 0x905   :  { %v6177_v1 = vpop.f32.mrb[57].mxu0 }
 0x906   :  { %v3517_v2 = vpop.f32.mrb[28].mxu1 }
 0x907   :  { %v6149_v4 = vpop.f32.mrb[29].mxu1 }
 0x908   :  { %v3973_v5 = vpop.f32.mrb[58].mxu0 }
 0x909   :  { %v6191_v6 = vpop.f32.mrb[59].mxu0 }
 0x90a   :  { %v3589_v9 = vpop.f32.mrb[30].mxu1 }
 0x90b   :  { %v3590_v10 = vadd.f32 %v3589_v9, %v3517_v2  ;;  %v6156_v11 = vpop.f32.mrb[31].mxu1 }
 0x90c   :  { %v4127_v3 = vpop.f32.mrb[60].mxu0 }
 0x90d   :  { %v6205_v12 = vpop.f32.mrb[61].mxu0 }
 0x90e   :  { %v3665_v13 = vpop.f32.mrb[32].mxu1 }
 0x90f   :  { %v3669_v14 = vadd.f32 %v3665_v13, %v3590_v10  ;;  %v6163_v15 = vpop.f32.mrb[33].mxu1 }
 0x910   :  { %v4281_v17 = vpop.f32.mrb[62].mxu0 }
 0x911   :  { %v6219_v18 = vpop.f32.mrb[63].mxu0 }
 0x912   :  { %v3742_v8 = vpop.f32.mrb[34].mxu1 }
 0x913   :  { %v3746_v19 = vadd.f32 %v3742_v8, %v3669_v14  ;;  %v6170_v20 = vpop.f32.mrb[35].mxu1 }
 0x914   :  { %v4435_v21 = vpop.f32.mrb[64].mxu0 }
 0x915   :  { %v6233_v22 = vpop.f32.mrb[65].mxu0  ;;  %v3823_v23 = vadd.f32 %v3819_v0, %v3746_v19 }
 0x916   :  { %v3896_v24 = vpop.f32.mrb[36].mxu1 }
 0x917   :  { %v3900_v26 = vadd.f32 %v3896_v24, %v3823_v23  ;;  %v6184_v27 = vpop.f32.mrb[37].mxu1 }
 0x918   :  { %v4589_v28 = vpop.f32.mrb[66].mxu0 }
 0x919   :  { %v6247_v29 = vpop.f32.mrb[67].mxu0  ;;  %v3977_v31 = vadd.f32 %v3973_v5, %v3900_v26 }
 0x91a   :  { %v4050_v32 = vpop.f32.mrb[38].mxu1 }
 0x91b   :  { %v4054_v33 = vadd.f32 %v4050_v32, %v3977_v31  ;;  %v6198_v34 = vpop.f32.mrb[39].mxu1 }
 0x91d   :  { %v4131_v36 = vadd.f32 %v4127_v3, %v4054_v33 }
 0x91e   :  { %v4204_v37 = vpop.f32.mrb[40].mxu1 }
 0x91f   :  { %v4208_v38 = vadd.f32 %v4204_v37, %v4131_v36  ;;  %v6212_v39 = vpop.f32.mrb[41].mxu1 }
 0x921   :  { %v4285_v40 = vadd.f32 %v4281_v17, %v4208_v38 }
 0x922   :  { %v4358_v41 = vpop.f32.mrb[42].mxu1 }
 0x923   :  { %v4362_v42 = vadd.f32 %v4358_v41, %v4285_v40  ;;  %v6226_v43 = vpop.f32.mrb[43].mxu1 }
 0x925   :  { %v4439_v45 = vadd.f32 %v4435_v21, %v4362_v42 }
 0x926   :  { %v4512_v46 = vpop.f32.mrb[44].mxu1 }
 0x927   :  { %v4516_v47 = vadd.f32 %v4512_v46, %v4439_v45  ;;  %v6240_v48 = vpop.f32.mrb[45].mxu1 }
 0x929   :  { %v4593_v49 = vadd.f32 %v4589_v28, %v4516_v47 }
 0x92a   :  { %v4666_v50 = vpop.f32.mrb[46].mxu1 }
 0x92b   :  { %v4670_v52 = vadd.f32 %v4666_v50, %v4593_v49  ;;  %v6254_v54 = vpop.f32.mrb[47].mxu1 }
 0x92d   :  { %v4678_v44 = vadd.f32 %v4894_v51, %v4670_v52 }
 0x92f   :  { %v4679_v53 = vsub.f32 0.0, %v4678_v44 }
 0x931   :  { %v4680_v62 = vmul.f32 1.442695, %v4679_v53 }
 0x933   :  { %6896 = vpow2.f32 %v4680_v62 }
 0x93d   :  { %v6897_v7 = vpop.eup %6896 }
 0x93e   :  { %v4682_v16 = vadd.f32 1.0, %v6897_v7 }
 0x940   :  { %6898 = vrcp.f32 %v4682_v16 }
 0x94a   :  { %v6899_v25 = vpop.eup %6898 }
 0x94b   :  { %4685 = vst [vmem:[%s7864_s9] sm:$0x3] %v6899_v25 }

</bundles_post_ra>
